<compile_context>
chip_gen: v7x
topology: tpu7x:2x2x1
jax: 0.10.0
libtpu: 0.0.40
codegen_flags: <defaults>
</compile_context>

<pallas_src>
import functools

import jax
import jax.numpy as jnp
from jax.experimental import pallas as pl
from jax.experimental.pallas import tpu as pltpu

LANE = 128
MIB = 1 << 20


def _vmem_capacity_bytes():
    try:
        cap = int(pltpu.get_tpu_info().vmem_capacity_bytes)
        return min(max(cap, 32 * MIB), 128 * MIB)
    except Exception:
        return 64 * MIB  # conservative: v7x has 64 MiB per TensorCore


_VMEM_CAP = _vmem_capacity_bytes()
VMEM_CEILING = max(_VMEM_CAP - 8 * MIB, 32 * MIB)       # never request more than this
RESIDENT_FEAT_BUDGET = min(_VMEM_CAP // 4, 24 * MIB)    # 2x (double-buffer) resident feat


def _round_up(x, m):
    return (x + m - 1) // m * m


def _pad2d(a, rows, cols):
    r, c = a.shape
    return jnp.pad(a, ((0, rows - r), (0, cols - c)))


# ---------------------------------------------------------------------------
# Tiled, fused GraphConv layer:
#   acc_i  += A[i,k] @ ( (d_in^{-1/2}[k] * X[k]) @ W )
#   out_i   = d_out^{-1/2}[i] * acc_i + b        (+ optional ReLU)
# grid = (row tiles, k reduction); int8 adjacency cast to bf16 in-kernel;
# f32 accumulator scratch; epilogue under pl.when.
# ---------------------------------------------------------------------------
def gcn_layer_kernel(adj_ref, feat_ref, w_ref, din_ref, dout_ref, b_ref,
                     o_ref, acc_ref, *, apply_relu, feat_resident, tk):
    k = pl.program_id(1)

    @pl.when(k == 0)
    def _():
        acc_ref[...] = jnp.zeros_like(acc_ref)

    if feat_resident:
        start = pl.multiple_of(k * tk, tk)
        x_blk = feat_ref[pl.ds(start, tk), :]
    else:
        x_blk = feat_ref[...]

    # Fold D_in^{-1/2} into the features in f32 (normalization stays exact in the
    # f32 path), then feed the MXU with bf16 operands and accumulate in f32.
    x_scaled = (x_blk.astype(jnp.float32) * din_ref[...]).astype(jnp.bfloat16)
    xw = jnp.dot(x_scaled, w_ref[...], preferred_element_type=jnp.float32)

    a = adj_ref[...]
    if a.dtype != jnp.bfloat16:
        # int8 0/1 adjacency -> bf16 (exact); two-step cast via f32 on the VPU,
        # hidden under the (HBM-bound) adjacency DMA.
        a = a.astype(jnp.float32).astype(jnp.bfloat16)
    acc_ref[...] += jnp.dot(a, xw.astype(jnp.bfloat16),
                            preferred_element_type=jnp.float32)

    @pl.when(k == pl.num_programs(1) - 1)
    def _():
        out = acc_ref[...] * dout_ref[...] + b_ref[...]
        if apply_relu:
            out = jnp.maximum(out, 0.0)
        o_ref[...] = out.astype(o_ref.dtype)


def _gcn_layer(adj, feat, w, din, dout, bias, *, tile, relu, out_dtype,
               feat_resident):
    n_pad = adj.shape[0]
    fin = feat.shape[1]
    fout = w.shape[1]
    tm = tk = tile
    grid = (n_pad // tm, n_pad // tk)

    if feat_resident:
        # Whole feature matrix resident (constant block index -> fetched once),
        # removing the per-row-tile re-streaming of feat from HBM.
        feat_spec = pl.BlockSpec((n_pad, fin), lambda i, k: (0, 0))
        feat_bytes = 2 * n_pad * fin * feat.dtype.itemsize
    else:
        feat_spec = pl.BlockSpec((tk, fin), lambda i, k: (k, 0))
        feat_bytes = 2 * tk * fin * feat.dtype.itemsize

    # Footprint-derived VMEM limit (double-buffered operands + scratch + in-kernel
    # f32 temporaries), clamped so it is valid on v7x (64 MiB) as well as v5e/v6e.
    est = (2 * tm * tk * adj.dtype.itemsize          # adjacency tiles
           + feat_bytes                               # feature stream / resident
           + 2 * fin * fout * 2                       # resident weights (bf16)
           + 2 * tm * fout * jnp.dtype(out_dtype).itemsize
           + tm * fout * 4                            # f32 accumulator scratch
           + 2 * (tk * fin + tk * fout) * 4           # in-kernel temporaries
           + 2 * (tm + tk + fout) * 4)                # scales / bias
    vmem_limit = int(min(max(2 * est, 16 * MIB), VMEM_CEILING))

    kernel = functools.partial(gcn_layer_kernel, apply_relu=relu,
                               feat_resident=feat_resident, tk=tk)
    return pl.pallas_call(
        kernel,
        out_shape=jax.ShapeDtypeStruct((n_pad, fout), out_dtype),
        grid_spec=pltpu.PrefetchScalarGridSpec(
            num_scalar_prefetch=0,
            grid=grid,
            in_specs=[
                pl.BlockSpec((tm, tk), lambda i, k: (i, k)),      # adjacency (int8)
                feat_spec,                                        # features (bf16)
                pl.BlockSpec((fin, fout), lambda i, k: (0, 0)),   # weights (resident)
                pl.BlockSpec((tk, 1), lambda i, k: (k, 0)),       # d_in^{-1/2}
                pl.BlockSpec((tm, 1), lambda i, k: (i, 0)),       # d_out^{-1/2}
                pl.BlockSpec((1, fout), lambda i, k: (0, 0)),     # bias (f32)
            ],
            out_specs=pl.BlockSpec((tm, fout), lambda i, k: (i, 0)),
            scratch_shapes=[pltpu.VMEM((tm, fout), jnp.float32)],
        ),
        compiler_params=pltpu.CompilerParams(
            # Row axis shards across TensorCores on megacore parts; reduction last.
            dimension_semantics=("parallel", "arbitrary"),
            vmem_limit_bytes=vmem_limit,
        ),
    )(adj, feat, w, din, dout, bias)


# ---------------------------------------------------------------------------
# Single fused two-layer kernel for small graphs (whole padded problem in VMEM):
# one pallas_call, one grid step, no HBM round trips of intermediates.
# ---------------------------------------------------------------------------
def gcn_fused_small_kernel(adj_ref, x_ref, w1_ref, b1_ref, w2_ref, b2_ref,
                           din_ref, dout_ref, o_ref):
    a = adj_ref[...]
    if a.dtype != jnp.bfloat16:
        a = a.astype(jnp.float32).astype(jnp.bfloat16)
    din = din_ref[...]
    dout = dout_ref[...]

    x = (x_ref[...].astype(jnp.float32) * din).astype(jnp.bfloat16)
    xw1 = jnp.dot(x, w1_ref[...], preferred_element_type=jnp.float32)
    h1 = jnp.dot(a, xw1.astype(jnp.bfloat16), preferred_element_type=jnp.float32)
    h1 = jnp.maximum(h1 * dout + b1_ref[...], 0.0)
    # dropout: identity at inference time (eval mode)
    h1 = (h1 * din).astype(jnp.bfloat16)

    hw2 = jnp.dot(h1, w2_ref[...], preferred_element_type=jnp.float32)
    out = jnp.dot(a, hw2.astype(jnp.bfloat16), preferred_element_type=jnp.float32)
    o_ref[...] = (out * dout + b2_ref[...]).astype(o_ref.dtype)


def _gcn_fused_small(adj, x, w1, b1, w2, b2, din, dout, out_dtype):
    n_pad = adj.shape[0]
    fin = x.shape[1]
    nh = w1.shape[1]
    nc = w2.shape[1]

    def full(shape):
        return pl.BlockSpec(shape, lambda i: (0,) * len(shape))

    return pl.pallas_call(
        gcn_fused_small_kernel,
        out_shape=jax.ShapeDtypeStruct((n_pad, nc), out_dtype),
        grid_spec=pltpu.PrefetchScalarGridSpec(
            num_scalar_prefetch=0,
            grid=(1,),
            in_specs=[full((n_pad, n_pad)), full((n_pad, fin)),
                      full((fin, nh)), full((1, nh)),
                      full((nh, nc)), full((1, nc)),
                      full((n_pad, 1)), full((n_pad, 1))],
            out_specs=full((n_pad, nc)),
        ),
        compiler_params=pltpu.CompilerParams(
            dimension_semantics=("arbitrary",),
            vmem_limit_bytes=int(VMEM_CEILING),
        ),
    )(adj, x, w1, b1, w2, b2, din, dout)


# ---------------------------------------------------------------------------
# One-time preprocessing (hoisted out of the per-call forward pass).
# ---------------------------------------------------------------------------
def prepare_gcn(adj, params, *, tile=512, feat_resident=None,
                allow_fused_small=True):
    """Precompute everything that is constant across forward calls:
      * D_out^{-1/2} / D_in^{-1/2} (clamped >= 1, DGL GraphConv norm='both')
      * adjacency stored as int8 0/1 (bf16 fallback for weighted graphs), padded
      * fc folded into gc2:  W2' = W2 @ Wfc,  b' = b2 @ Wfc + bfc
      * all feature dims lane-padded to 128, rows padded to the tile size.
    """
    N = adj.shape[0]
    nfeat, nhid = params["w1"].shape
    nclass = params["wfc"].shape[1]

    adj = adj.astype(jnp.float32)
    out_deg = jnp.clip(adj.sum(axis=1), 1.0, None)
    in_deg = jnp.clip(adj.sum(axis=0), 1.0, None)
    dout = (out_deg ** -0.5)[:, None]     # row scale, applied in the epilogue
    din = (in_deg ** -0.5)[:, None]       # col scale, folded into the features

    tile_eff = tile if N > tile else _round_up(max(N, 8), LANE)
    n_pad = _round_up(N, tile_eff)

    nfeat_p = _round_up(nfeat, LANE)
    nhid_p = _round_up(nhid, LANE)
    nclass_p = _round_up(nclass, LANE)

    binary = bool(jnp.all((adj == 0.0) | (adj == 1.0)))
    adj_dtype = jnp.int8 if binary else jnp.bfloat16
    adj_p = _pad2d(adj, n_pad, n_pad).astype(adj_dtype)
    din_p = _pad2d(din, n_pad, 1).astype(jnp.float32)
    dout_p = _pad2d(dout, n_pad, 1).astype(jnp.float32)

    # Fold the fc layer into gc2 in f32 (host-side, once).
    w2f = params["w2"] @ params["wfc"]
    b2f = params["b2"] @ params["wfc"] + params["bfc"]

    w1_p = _pad2d(params["w1"], nfeat_p, nhid_p).astype(jnp.bfloat16)
    b1_p = _pad2d(params["b1"], 1, nhid_p).astype(jnp.float32)
    w2_p = _pad2d(w2f, nhid_p, nclass_p).astype(jnp.bfloat16)
    b2_p = _pad2d(b2f, 1, nclass_p).astype(jnp.float32)

    if feat_resident is None:
        feat_bytes = n_pad * max(nfeat_p, nhid_p) * 2
        feat_resident = 2 * feat_bytes <= RESIDENT_FEAT_BUDGET

    small_est = (n_pad * n_pad * jnp.dtype(adj_dtype).itemsize
                 + n_pad * (2 * nfeat_p + 6 * 4 * nhid_p + 2 * 4 * nclass_p)
                 + (nfeat_p * nhid_p + nhid_p * nclass_p) * 2)
    use_fused_small = bool(allow_fused_small
                           and 3 * small_est + 8 * MIB <= VMEM_CEILING)

    return {
        "N": N, "n_pad": n_pad, "tile": tile_eff,
        "nfeat_p": nfeat_p, "nclass": nclass,
        "adj": adj_p, "din": din_p, "dout": dout_p,
        "w1": w1_p, "b1": b1_p, "w2": w2_p, "b2": b2_p,
        "feat_resident": bool(feat_resident),
        "use_fused_small": use_fused_small,
    }


def gcn_forward(prep, x):
    """Eval-mode GCN forward. x: [N, nfeat] f32 -> logits [N, nclass] f32."""
    N = prep["N"]
    x_p = _pad2d(x.astype(jnp.float32), prep["n_pad"],
                 prep["nfeat_p"]).astype(jnp.bfloat16)

    if prep["use_fused_small"]:
        out_p = _gcn_fused_small(prep["adj"], x_p, prep["w1"], prep["b1"],
                                 prep["w2"], prep["b2"], prep["din"],
                                 prep["dout"], jnp.float32)
    else:
        # gc1: H1 = relu(Ahat @ (X @ W1) + b1)
        h1 = _gcn_layer(prep["adj"], x_p, prep["w1"], prep["din"], prep["dout"],
                        prep["b1"], tile=prep["tile"], relu=True,
                        out_dtype=jnp.bfloat16,
                        feat_resident=prep["feat_resident"])
        # TODO(synk): training-mode dropout (pltpu.prng_seed / prng_random_bits
        # mask) not emitted; eval mode is identity.
        # gc2 + fc folded: out = Ahat @ (H1 @ W2') + b'
        out_p = _gcn_layer(prep["adj"], h1, prep["w2"], prep["din"],
                           prep["dout"], prep["b2"], tile=prep["tile"],
                           relu=False, out_dtype=jnp.float32,
                           feat_resident=prep["feat_resident"])
    return out_p[:N, :prep["nclass"]]


# ---------------------------------------------------------------------------
# Parameters / reference
# ---------------------------------------------------------------------------
def init_params(key, nfeat, nhid, nclass):
    """Weights stored pre-transposed as (in, out); biases as (1, out)."""
    k1, k2, k3, k4 = jax.random.split(key, 4)
    w1 = jax.random.normal(k1, (nfeat, nhid), jnp.float32) * (2.0 / (nfeat + nhid)) ** 0.5
    b1 = jnp.zeros((1, nhid), jnp.float32)
    w2 = jax.random.normal(k2, (nhid, nhid), jnp.float32) * (2.0 / (nhid + nhid)) ** 0.5
    b2 = jnp.zeros((1, nhid), jnp.float32)
    bound = 1.0 / (nhid ** 0.5)
    wfc = jax.random.uniform(k3, (nhid, nclass), jnp.float32, -bound, bound)
    bfc = jax.random.uniform(k4, (1, nclass), jnp.float32, -bound, bound)
    return {"w1": w1, "b1": b1, "w2": w2, "b2": b2, "wfc": wfc, "bfc": bfc}


def reference_forward(adj, x, params):
    """Pure-JAX f32 reference of the original module semantics."""
    out_deg = jnp.clip(adj.sum(axis=1), 1.0, None)
    in_deg = jnp.clip(adj.sum(axis=0), 1.0, None)
    ahat = (out_deg ** -0.5)[:, None] * adj * (in_deg ** -0.5)[None, :]
    h1 = jnp.maximum(ahat @ (x @ params["w1"]) + params["b1"], 0.0)
    h2 = ahat @ (h1 @ params["w2"]) + params["b2"]
    return h2 @ params["wfc"] + params["bfc"]


if __name__ == "__main__":
    key = jax.random.PRNGKey(0)
    nfeat, nhid, nclass = 32, 32, 8
    params = init_params(jax.random.fold_in(key, 0), nfeat, nhid, nclass)

    def make_case(subkey, n, p_edge):
        kx, ka = jax.random.split(subkey)
        x = jax.random.normal(kx, (n, nfeat), jnp.float32)
        a = (jax.random.uniform(ka, (n, n)) < p_edge).astype(jnp.float32)
        a = jnp.maximum(a, jnp.eye(n, dtype=jnp.float32))
        return a, x

    # --- case 1: small graph -> single fused two-layer kernel (one grid step)
    adj1, x1 = make_case(jax.random.fold_in(key, 1), 256, 0.05)
    prep1 = prepare_gcn(adj1, params)
    out1 = gcn_forward(prep1, x1)
    jax.block_until_ready(out1)
    ref1 = reference_forward(adj1, x1, params)
    assert out1.shape == (256, nclass)
    assert prep1["use_fused_small"]
    assert jnp.allclose(out1, ref1, atol=1e-1, rtol=1e-1), (
        f"fused-small max abs err = {float(jnp.max(jnp.abs(out1 - ref1)))}")

    # --- case 2: tiled path, 512 tiles, resident features, (2,2) reduction grid
    adj2, x2 = make_case(jax.random.fold_in(key, 2), 1024, 0.01)
    ref2 = reference_forward(adj2, x2, params)
    prep2 = prepare_gcn(adj2, params, tile=512, allow_fused_small=False)
    assert not prep2["use_fused_small"] and prep2["feat_resident"]
    out2 = gcn_forward(prep2, x2)
    jax.block_until_ready(out2)
    assert jnp.allclose(out2, ref2, atol=1e-1, rtol=1e-1), (
        f"tiled-resident max abs err = {float(jnp.max(jnp.abs(out2 - ref2)))}")

    # --- case 3: tiled path, streamed features (large-graph fallback), 256 tiles
    prep3 = prepare_gcn(adj2, params, tile=256, allow_fused_small=False,
                        feat_resident=False)
    out3 = gcn_forward(prep3, x2)
    jax.block_until_ready(out3)
    assert jnp.allclose(out3, ref2, atol=1e-1, rtol=1e-1), (
        f"tiled-streamed max abs err = {float(jnp.max(jnp.abs(out3 - ref2)))}")

    print("KERNEL_OK")
</pallas_src>

<mosaic_0001>
module attributes {stable_mosaic.version = 11 : i64} {
  func.func @gcn_fused_small_kernel(%arg0: i32, %arg1: memref<256x256xi8, #tpu.memory_space<vmem>>, %arg2: memref<256x128xbf16, #tpu.memory_space<vmem>>, %arg3: memref<128x128xbf16, #tpu.memory_space<vmem>>, %arg4: memref<1x128xf32, #tpu.memory_space<vmem>>, %arg5: memref<128x128xbf16, #tpu.memory_space<vmem>>, %arg6: memref<1x128xf32, #tpu.memory_space<vmem>>, %arg7: memref<256x1xf32, #tpu.memory_space<vmem>>, %arg8: memref<256x1xf32, #tpu.memory_space<vmem>>, %arg9: memref<256x128xf32, #tpu.memory_space<vmem>>) attributes {dimension_semantics = [#tpu.dimension_semantics<arbitrary>], iteration_bounds = array<i64: 1>, scalar_prefetch = 0 : i64, scratch_operands = 0 : i64, tpu.core_type = #tpu.core_type<tc>, window_params = [{pipeline_mode = #tpu.pipeline_mode<synchronous>, transform_indices = @transform_0, window_bounds = array<i64: 256, 256>}, {pipeline_mode = #tpu.pipeline_mode<synchronous>, transform_indices = @transform_1, window_bounds = array<i64: 256, 128>}, {pipeline_mode = #tpu.pipeline_mode<synchronous>, transform_indices = @transform_2, window_bounds = array<i64: 128, 128>}, {pipeline_mode = #tpu.pipeline_mode<synchronous>, transform_indices = @transform_3, window_bounds = array<i64: 1, 128>}, {pipeline_mode = #tpu.pipeline_mode<synchronous>, transform_indices = @transform_4, window_bounds = array<i64: 128, 128>}, {pipeline_mode = #tpu.pipeline_mode<synchronous>, transform_indices = @transform_5, window_bounds = array<i64: 1, 128>}, {pipeline_mode = #tpu.pipeline_mode<synchronous>, transform_indices = @transform_6, window_bounds = array<i64: 256, 1>}, {pipeline_mode = #tpu.pipeline_mode<synchronous>, transform_indices = @transform_7, window_bounds = array<i64: 256, 1>}, {pipeline_mode = #tpu.pipeline_mode<synchronous>, transform_indices = @transform_8, window_bounds = array<i64: 256, 128>}]} {
    %c0 = arith.constant 0 : index
    %c0_0 = arith.constant 0 : index
    %0 = vector.load %arg1[%c0, %c0_0] : memref<256x256xi8, #tpu.memory_space<vmem>>, vector<256x256xi8>
    %1 = arith.sitofp %0 : vector<256x256xi8> to vector<256x256xf32>
    %2 = arith.truncf %1 : vector<256x256xf32> to vector<256x256xbf16>
    %c0_1 = arith.constant 0 : index
    %c0_2 = arith.constant 0 : index
    %3 = vector.load %arg7[%c0_1, %c0_2] : memref<256x1xf32, #tpu.memory_space<vmem>>, vector<256x1xf32>
    %c0_3 = arith.constant 0 : index
    %c0_4 = arith.constant 0 : index
    %4 = vector.load %arg8[%c0_3, %c0_4] : memref<256x1xf32, #tpu.memory_space<vmem>>, vector<256x1xf32>
    %c0_5 = arith.constant 0 : index
    %c0_6 = arith.constant 0 : index
    %5 = vector.load %arg2[%c0_5, %c0_6] : memref<256x128xbf16, #tpu.memory_space<vmem>>, vector<256x128xbf16>
    %6 = arith.extf %5 : vector<256x128xbf16> to vector<256x128xf32>
    %7 = vector.broadcast %3 : vector<256x1xf32> to vector<256x128xf32>
    %8 = arith.mulf %6, %7 : vector<256x128xf32>
    %9 = arith.truncf %8 : vector<256x128xf32> to vector<256x128xbf16>
    %c0_7 = arith.constant 0 : index
    %c0_8 = arith.constant 0 : index
    %10 = vector.load %arg3[%c0_7, %c0_8] : memref<128x128xbf16, #tpu.memory_space<vmem>>, vector<128x128xbf16>
    %cst = arith.constant dense<0.000000e+00> : vector<256x128xf32>
    %11 = tpu.matmul %9, %10, %cst {dimension_numbers = #tpu.dot_dimension_numbers<[1], [0], [0], [1], [0, 0, 1, 1], [], []>} : vector<256x128xbf16>, vector<128x128xbf16>, vector<256x128xf32> -> vector<256x128xf32>
    %12 = arith.truncf %11 : vector<256x128xf32> to vector<256x128xbf16>
    %cst_9 = arith.constant dense<0.000000e+00> : vector<256x128xf32>
    %13 = tpu.matmul %2, %12, %cst_9 {dimension_numbers = #tpu.dot_dimension_numbers<[1], [0], [0], [1], [0, 0, 1, 1], [], []>} : vector<256x256xbf16>, vector<256x128xbf16>, vector<256x128xf32> -> vector<256x128xf32>
    %14 = vector.broadcast %4 : vector<256x1xf32> to vector<256x128xf32>
    %15 = arith.mulf %13, %14 : vector<256x128xf32>
    %c0_10 = arith.constant 0 : index
    %c0_11 = arith.constant 0 : index
    %16 = vector.load %arg4[%c0_10, %c0_11] : memref<1x128xf32, #tpu.memory_space<vmem>>, vector<1x128xf32>
    %17 = vector.broadcast %16 : vector<1x128xf32> to vector<256x128xf32>
    %18 = arith.addf %15, %17 : vector<256x128xf32>
    %cst_12 = arith.constant 0.000000e+00 : f32
    %19 = vector.broadcast %cst_12 : f32 to vector<256x128xf32>
    %20 = arith.maximumf %18, %19 : vector<256x128xf32>
    %21 = vector.broadcast %3 : vector<256x1xf32> to vector<256x128xf32>
    %22 = arith.mulf %20, %21 : vector<256x128xf32>
    %23 = arith.truncf %22 : vector<256x128xf32> to vector<256x128xbf16>
    %c0_13 = arith.constant 0 : index
    %c0_14 = arith.constant 0 : index
    %24 = vector.load %arg5[%c0_13, %c0_14] : memref<128x128xbf16, #tpu.memory_space<vmem>>, vector<128x128xbf16>
    %cst_15 = arith.constant dense<0.000000e+00> : vector<256x128xf32>
    %25 = tpu.matmul %23, %24, %cst_15 {dimension_numbers = #tpu.dot_dimension_numbers<[1], [0], [0], [1], [0, 0, 1, 1], [], []>} : vector<256x128xbf16>, vector<128x128xbf16>, vector<256x128xf32> -> vector<256x128xf32>
    %26 = arith.truncf %25 : vector<256x128xf32> to vector<256x128xbf16>
    %cst_16 = arith.constant dense<0.000000e+00> : vector<256x128xf32>
    %27 = tpu.matmul %2, %26, %cst_16 {dimension_numbers = #tpu.dot_dimension_numbers<[1], [0], [0], [1], [0, 0, 1, 1], [], []>} : vector<256x256xbf16>, vector<256x128xbf16>, vector<256x128xf32> -> vector<256x128xf32>
    %28 = vector.broadcast %4 : vector<256x1xf32> to vector<256x128xf32>
    %29 = arith.mulf %27, %28 : vector<256x128xf32>
    %c0_17 = arith.constant 0 : index
    %c0_18 = arith.constant 0 : index
    %30 = vector.load %arg6[%c0_17, %c0_18] : memref<1x128xf32, #tpu.memory_space<vmem>>, vector<1x128xf32>
    %31 = vector.broadcast %30 : vector<1x128xf32> to vector<256x128xf32>
    %32 = arith.addf %29, %31 : vector<256x128xf32>
    %c0_19 = arith.constant 0 : index
    %c0_20 = arith.constant 0 : index
    %33 = vector.load %arg9[%c0_19, %c0_20] : memref<256x128xf32, #tpu.memory_space<vmem>>, vector<256x128xf32>
    tpu.vector_store %arg9[%c0_19, %c0_20], %32 {strides = array<i32>} : memref<256x128xf32, #tpu.memory_space<vmem>>, vector<256x128xf32>,
    return
  }
  func.func @transform_0(%arg0: i32) -> (i32, i32) {
    %c0_i32 = arith.constant 0 : i32
    %c0_i32_0 = arith.constant 0 : i32
    %c0_i32_1 = arith.constant 0 : i32
    return %c0_i32, %c0_i32_0 : i32, i32
  }
  func.func @transform_1(%arg0: i32) -> (i32, i32) {
    %c0_i32 = arith.constant 0 : i32
    %c0_i32_0 = arith.constant 0 : i32
    %c0_i32_1 = arith.constant 0 : i32
    return %c0_i32, %c0_i32_0 : i32, i32
  }
  func.func @transform_2(%arg0: i32) -> (i32, i32) {
    %c0_i32 = arith.constant 0 : i32
    %c0_i32_0 = arith.constant 0 : i32
    %c0_i32_1 = arith.constant 0 : i32
    return %c0_i32, %c0_i32_0 : i32, i32
  }
  func.func @transform_3(%arg0: i32) -> (i32, i32) {
    %c0_i32 = arith.constant 0 : i32
    %c0_i32_0 = arith.constant 0 : i32
    %c0_i32_1 = arith.constant 0 : i32
    return %c0_i32, %c0_i32_0 : i32, i32
  }
  func.func @transform_4(%arg0: i32) -> (i32, i32) {
    %c0_i32 = arith.constant 0 : i32
    %c0_i32_0 = arith.constant 0 : i32
    %c0_i32_1 = arith.constant 0 : i32
    return %c0_i32, %c0_i32_0 : i32, i32
  }
  func.func @transform_5(%arg0: i32) -> (i32, i32) {
    %c0_i32 = arith.constant 0 : i32
    %c0_i32_0 = arith.constant 0 : i32
    %c0_i32_1 = arith.constant 0 : i32
    return %c0_i32, %c0_i32_0 : i32, i32
  }
  func.func @transform_6(%arg0: i32) -> (i32, i32) {
    %c0_i32 = arith.constant 0 : i32
    %c0_i32_0 = arith.constant 0 : i32
    %c0_i32_1 = arith.constant 0 : i32
    return %c0_i32, %c0_i32_0 : i32, i32
  }
  func.func @transform_7(%arg0: i32) -> (i32, i32) {
    %c0_i32 = arith.constant 0 : i32
    %c0_i32_0 = arith.constant 0 : i32
    %c0_i32_1 = arith.constant 0 : i32
    return %c0_i32, %c0_i32_0 : i32, i32
  }
  func.func @transform_8(%arg0: i32) -> (i32, i32) {
    %c0_i32 = arith.constant 0 : i32
    %c0_i32_0 = arith.constant 0 : i32
    %c0_i32_1 = arith.constant 0 : i32
    return %c0_i32, %c0_i32_0 : i32, i32
  }
}

</mosaic_0001>

<bundles_post_ra>
// kernel: tpu_custom_call.1
= control target key start
LH: loop header
LB: loop body
LE: loop exit
PB: predicated region body
PF: predicated region fallthrough
CT: control target
= control target key end

     0   :  { %v2160_v2 = vmov 0   ;;  %s3079_s0 = inlined_call_operand.vmem [shape: s8[256,256], index: 0, kind: input, shape index: {}]   ;;  %s3080_s1 = inlined_call_operand.vmem [shape: bf16[256,128], index: 1, kind: input, shape index: {}]   ;;  %s3081_s2 = inlined_call_operand.vmem [shape: bf16[128,128], index: 2, kind: input, shape index: {}]   ;;  %s3082_s3 = inlined_call_operand.vmem [shape: f32[1,128], index: 3, kind: input, shape index: {}]   ;;  %s3083_s4 = inlined_call_operand.vmem [shape: bf16[128,128], index: 4, kind: input, shape index: {}]   ;;  %s3084_s5 = inlined_call_operand.vmem [shape: f32[1,128], index: 5, kind: input, shape index: {}]   ;;  %s3085_s6 = inlined_call_operand.vmem [shape: f32[256,1], index: 6, kind: input, shape index: {}]   ;;  %s3086_s7 = inlined_call_operand.vmem [shape: f32[256,1], index: 7, kind: input, shape index: {}]   ;;  %s3087_s8 = inlined_call_operand.hbm [shape: f32[256,128], index: 8, kind: output, shape index: {}]  }
   0x1   :  { %v81_v0 = vld [vmem:[%s3085_s6 + $0x10] sm:$0xff]  ;;  %v79_v1 = vld [vmem:[%s3085_s6] sm:$0xff]  ;;  %2119 = vset.pattern.permute.xlu1 %v2160_v2  ;;  %2118 = vset.pattern.permute.xlu0 %v2160_v2  ;;  %v82_v3 = vld [vmem:[%s3085_s6 + $0x18] sm:$0xff] }
   0x2   :  { %219 = vperm.xlu1 %2119, %v81_v0   ;;  %209 = vperm.xlu0 %2118, %v79_v1   ;;  %v80_v4 = vld [vmem:[%s3085_s6 + $0x8] sm:$0xff]  ;;  %v83_v6 = vld [vmem:[%s3085_s6 + $0x20] sm:$0xff]  ;;  %v86_v7 = vld [vmem:[%s3085_s6 + $0x38] sm:$0xff] }
   0x3   :  { %v84_v5 = vld [vmem:[%s3085_s6 + $0x28] sm:$0xff]  ;;  %v85_v8 = vld [vmem:[%s3085_s6 + $0x30] sm:$0xff]  ;;  %v87_v10 = vld [vmem:[%s3085_s6 + $0x40] sm:$0xff] }
   0x4   :  { %v88_v9 = vld [vmem:[%s3085_s6 + $0x48] sm:$0xff]  ;;  %v2120_v11 = vld [vmem:[%s3081_s2] sm:$0xff]   ;;  %v90_v12 = vld [vmem:[%s3085_s6 + $0x58] sm:$0xff] }
   0x5   :  { %v89_v13 = vld [vmem:[%s3085_s6 + $0x50] sm:$0xff]  ;;  %2018 = vmatprep.subr.bf16.mxu1 %v2120_v11  ;;  %v2121_v14 = vld [vmem:[%s3081_s2 + $0x8] sm:$0xff]   ;;  %v91_v16 = vld [vmem:[%s3085_s6 + $0x60] sm:$0xff] }
   0x6   :  { %224 = vperm.xlu1 %2119, %v82_v3   ;;  %214 = vperm.xlu0 %2118, %v80_v4   ;;  %v92_v15 = vld [vmem:[%s3085_s6 + $0x68] sm:$0xff]  ;;  %v2122_v17 = vld [vmem:[%s3081_s2 + $0x10] sm:$0xff]   ;;  %v94_v18 = vld [vmem:[%s3085_s6 + $0x78] sm:$0xff] }
   0x7   :  { %2019 = vmatpush3.bf16.msra.mxu1 %v2120_v11  ;;  %v93_v19 = vld [vmem:[%s3085_s6 + $0x70] sm:$0xff]  ;;  %v2123_v20 = vld [vmem:[%s3081_s2 + $0x18] sm:$0xff]   ;;  %v96_v21 = vld [vmem:[%s3085_s6 + $0x88] sm:$0xff] }
   0x8   :  { %2020 = vmatprep.subr.bf16.mxu1 %v2121_v14  ;;  %v95_v22 = vld [vmem:[%s3085_s6 + $0x80] sm:$0xff]  ;;  %v98_v24 = vld [vmem:[%s3085_s6 + $0x98] sm:$0xff]  ;;  %v97_v25 = vld [vmem:[%s3085_s6 + $0x90] sm:$0xff] }
   0x9   :  { %v2124_v23 = vld [vmem:[%s3081_s2 + $0x20] sm:$0xff]   ;;  %v2125_v26 = vld [vmem:[%s3081_s2 + $0x28] sm:$0xff]  }
   0xa   :  { %234 = vperm.xlu1 %2119, %v84_v5   ;;  %229 = vperm.xlu0 %2118, %v83_v6  }
   0xb   :  { %2021 = vmatpush3.bf16.msra.mxu1 %v2121_v14 }
   0xc   :  { %2022 = vmatprep.subr.bf16.mxu1 %v2122_v17 }
   0xe   :  { %244 = vperm.xlu1 %2119, %v86_v7   ;;  %239 = vperm.xlu0 %2118, %v85_v8  }
   0xf   :  { %2023 = vmatpush3.bf16.msra.mxu1 %v2122_v17 }
  0x10   :  { %2024 = vmatprep.subr.bf16.mxu1 %v2123_v20 }
  0x12   :  { %254 = vperm.xlu1 %2119, %v88_v9   ;;  %249 = vperm.xlu0 %2118, %v87_v10  }
  0x13   :  { %2025 = vmatpush3.bf16.msra.mxu1 %v2123_v20 }
  0x14   :  { %2026 = vmatprep.subr.bf16.mxu1 %v2124_v23 }
  0x16   :  { %264 = vperm.xlu1 %2119, %v90_v12   ;;  %259 = vperm.xlu0 %2118, %v89_v13  }
  0x17   :  { %2027 = vmatpush3.bf16.msra.mxu1 %v2124_v23 }
  0x1a   :  { %274 = vperm.xlu1 %2119, %v92_v15   ;;  %269 = vperm.xlu0 %2118, %v91_v16  }
  0x1e   :  { %284 = vperm.xlu1 %2119, %v94_v18   ;;  %279 = vperm.xlu0 %2118, %v93_v19  }
  0x22   :  { %294 = vperm.xlu1 %2119, %v96_v21   ;;  %289 = vperm.xlu0 %2118, %v95_v22  }
  0x26   :  { %304 = vperm.xlu1 %2119, %v98_v24   ;;  %299 = vperm.xlu0 %2118, %v97_v25  }
  0x27   :  { %13 = vsyncpa [#allocation3], 0  ;;  %v100_v27 = vld [vmem:[%s3085_s6 + $0xa8] sm:$0xff]  ;;  %v99_v28 = vld [vmem:[%s3085_s6 + $0xa0] sm:$0xff]  ;;  %2028 = vmatprep.subr.bf16.mxu1 %v2125_v26 }
  0x28   :  { %v2126_v29 = vld [vmem:[%s3081_s2 + $0x30] sm:$0xff]   ;;  %2029 = vmatpush3.bf16.msra.mxu1 %v2125_v26  ;;  %v102_v30 = vld [vmem:[%s3085_s6 + $0xb8] sm:$0xff]  ;;  %v104_v33 = vld [vmem:[%s3085_s6 + $0xc8] sm:$0xff] }
  0x29   :  { %v101_v31 = vld [vmem:[%s3085_s6 + $0xb0] sm:$0xff]  ;;  %2030 = vmatprep.subr.bf16.mxu1 %v2126_v29  ;;  %v2127_v32 = vld [vmem:[%s3081_s2 + $0x38] sm:$0xff]   ;;  %v103_v34 = vld [vmem:[%s3085_s6 + $0xc0] sm:$0xff] }
  0x2a   :  { %314 = vperm.xlu1 %2119, %v100_v27   ;;  %309 = vperm.xlu0 %2118, %v99_v28   ;;  %v106_v35 = vld [vmem:[%s3085_s6 + $0xd8] sm:$0xff]  ;;  %v105_v36 = vld [vmem:[%s3085_s6 + $0xd0] sm:$0xff]  ;;  %v108_v37 = vld [vmem:[%s3085_s6 + $0xe8] sm:$0xff] }
  0x2b   :  { %v107_v38 = vld [vmem:[%s3085_s6 + $0xe0] sm:$0xff]  ;;  %v110_v39 = vld [vmem:[%s3085_s6 + $0xf8] sm:$0xff]  ;;  %v109_v40 = vld [vmem:[%s3085_s6 + $0xf0] sm:$0xff] }
  0x2c   :  { %2031 = vmatpush3.bf16.msra.mxu1 %v2126_v29  ;;  %v112_v41 = vld [vmem:[%s3086_s7 + $0x8] sm:$0xff]  ;;  %v111_v42 = vld [vmem:[%s3086_s7] sm:$0xff]  ;;  %v114_v43 = vld [vmem:[%s3086_s7 + $0x18] sm:$0xff] }
  0x2d   :  { %2032 = vmatprep.subr.bf16.mxu1 %v2127_v32  ;;  %v113_v44 = vld [vmem:[%s3086_s7 + $0x10] sm:$0xff]  ;;  %v116_v45 = vld [vmem:[%s3086_s7 + $0x28] sm:$0xff]  ;;  %v115_v46 = vld [vmem:[%s3086_s7 + $0x20] sm:$0xff] }
  0x2e   :  { %324 = vperm.xlu1 %2119, %v102_v30   ;;  %319 = vperm.xlu0 %2118, %v101_v31   ;;  %v118_v47 = vld [vmem:[%s3086_s7 + $0x38] sm:$0xff]  ;;  %v117_v48 = vld [vmem:[%s3086_s7 + $0x30] sm:$0xff]  ;;  %v120_v49 = vld [vmem:[%s3086_s7 + $0x48] sm:$0xff] }
  0x2f   :  { %v119_v50 = vld [vmem:[%s3086_s7 + $0x40] sm:$0xff]  ;;  %v122_v51 = vld [vmem:[%s3086_s7 + $0x58] sm:$0xff]  ;;  %v121_v52 = vld [vmem:[%s3086_s7 + $0x50] sm:$0xff] }
  0x30   :  { %2033 = vmatpush3.bf16.msra.mxu1 %v2127_v32  ;;  %v124_v53 = vld [vmem:[%s3086_s7 + $0x68] sm:$0xff]  ;;  %v123_v54 = vld [vmem:[%s3086_s7 + $0x60] sm:$0xff]  ;;  %v126_v55 = vld [vmem:[%s3086_s7 + $0x78] sm:$0xff] }
  0x31   :  { %v125_v56 = vld [vmem:[%s3086_s7 + $0x70] sm:$0xff]  ;;  %v128_v57 = vld [vmem:[%s3086_s7 + $0x88] sm:$0xff]  ;;  %v127_v58 = vld [vmem:[%s3086_s7 + $0x80] sm:$0xff] }
  0x32   :  { %334 = vperm.xlu1 %2119, %v104_v33   ;;  %329 = vperm.xlu0 %2118, %v103_v34   ;;  %v130_v59 = vld [vmem:[%s3086_s7 + $0x98] sm:$0xff]  ;;  %v129_v60 = vld [vmem:[%s3086_s7 + $0x90] sm:$0xff]  ;;  %v132_v61 = vld [vmem:[%s3086_s7 + $0xa8] sm:$0xff] }
  0x33   :  { %v131_v62 = vld [vmem:[%s3086_s7 + $0xa0] sm:$0xff]  ;;  %v134_v63 = vld [vmem:[%s3086_s7 + $0xb8] sm:$0xff]  ;;  %v133_v0 = vld [vmem:[%s3086_s7 + $0xb0] sm:$0xff] }
  0x34   :  { %v136_v1 = vld [vmem:[%s3086_s7 + $0xc8] sm:$0xff]  ;;  %v135_v2 = vld [vmem:[%s3086_s7 + $0xc0] sm:$0xff]  ;;  %v138_v3 = vld [vmem:[%s3086_s7 + $0xd8] sm:$0xff] }
  0x35   :  { %v137_v4 = vld [vmem:[%s3086_s7 + $0xd0] sm:$0xff]  ;;  %v140_v5 = vld [vmem:[%s3086_s7 + $0xe8] sm:$0xff]  ;;  %v139_v6 = vld [vmem:[%s3086_s7 + $0xe0] sm:$0xff] }
  0x36   :  { %344 = vperm.xlu1 %2119, %v106_v35   ;;  %339 = vperm.xlu0 %2118, %v105_v36   ;;  %v142_v7 = vld [vmem:[%s3086_s7 + $0xf8] sm:$0xff]  ;;  %v141_v8 = vld [vmem:[%s3086_s7 + $0xf0] sm:$0xff]  ;;  %v1731_v9 = vld [vmem:[%s3080_s1 + $0x8] sm:$0xff]  }
  0x37   :  { %v1668_v10 = vld [vmem:[%s3080_s1] sm:$0xff]   ;;  %v1673_v13 = vunpack.c.l.bf16 %v1731_v9  ;;  %v1674_v15 = vunpack.c.h.bf16 %v1731_v9  ;;  %v1732_v17 = vld [vmem:[%s3080_s1 + $0x10] sm:$0xff]   ;;  %v1733_v26 = vld [vmem:[%s3080_s1 + $0x18] sm:$0xff]  }
  0x38   :  { %v1669_v14 = vunpack.c.l.bf16 %v1668_v10  ;;  %v1670_v16 = vunpack.c.h.bf16 %v1668_v10  ;;  %v1678_v20 = vunpack.c.h.bf16 %v1732_v17  ;;  %v1677_v21 = vunpack.c.l.bf16 %v1732_v17  ;;  %v1734_v35 = vld [vmem:[%s3080_s1 + $0x20] sm:$0xff]  }
  0x39   :  { %v1682_v33 = vunpack.c.h.bf16 %v1733_v26  ;;  %v1681_v34 = vunpack.c.l.bf16 %v1733_v26 }
  0x3a   :  { %354 = vperm.xlu1 %2119, %v108_v37   ;;  %349 = vperm.xlu0 %2118, %v107_v38  }
  0x3e   :  { %364 = vperm.xlu1 %2119, %v110_v39   ;;  %359 = vperm.xlu0 %2118, %v109_v40  }
  0x42   :  { %824 = vperm.xlu1 %2119, %v112_v41   ;;  %819 = vperm.xlu0 %2118, %v111_v42   ;;  %v1686_v41 = vunpack.c.h.bf16 %v1734_v35  ;;  %v1685_v42 = vunpack.c.l.bf16 %v1734_v35 }
  0x46   :  { %834 = vperm.xlu1 %2119, %v114_v43   ;;  %829 = vperm.xlu0 %2118, %v113_v44   ;;  %v1735_v43 = vld [vmem:[%s3080_s1 + $0x28] sm:$0xff]  }
  0x4a   :  { %844 = vperm.xlu1 %2119, %v116_v45   ;;  %839 = vperm.xlu0 %2118, %v115_v46  }
  0x4e   :  { %854 = vperm.xlu1 %2119, %v118_v47   ;;  %849 = vperm.xlu0 %2118, %v117_v48  }
  0x52   :  { %864 = vperm.xlu1 %2119, %v120_v49   ;;  %859 = vperm.xlu0 %2118, %v119_v50   ;;  %v1690_v49 = vunpack.c.h.bf16 %v1735_v43  ;;  %v1689_v50 = vunpack.c.l.bf16 %v1735_v43  ;;  %v1742_v43 = vld [vmem:[%s3080_s1 + $0x60] sm:$0xff]  }
  0x56   :  { %874 = vperm.xlu1 %2119, %v122_v51   ;;  %869 = vperm.xlu0 %2118, %v121_v52   ;;  %v1736_v51 = vld [vmem:[%s3080_s1 + $0x30] sm:$0xff]  }
  0x5a   :  { %884 = vperm.xlu1 %2119, %v124_v53   ;;  %879 = vperm.xlu0 %2118, %v123_v54  }
  0x5e   :  { %894 = vperm.xlu1 %2119, %v126_v55   ;;  %889 = vperm.xlu0 %2118, %v125_v56  }
  0x62   :  { %904 = vperm.xlu1 %2119, %v128_v57   ;;  %899 = vperm.xlu0 %2118, %v127_v58   ;;  %v1694_v57 = vunpack.c.h.bf16 %v1736_v51  ;;  %v1693_v58 = vunpack.c.l.bf16 %v1736_v51  ;;  %v1718_v51 = vunpack.c.h.bf16 %v1742_v43 }
  0x66   :  { %914 = vperm.xlu1 %2119, %v130_v59   ;;  %909 = vperm.xlu0 %2118, %v129_v60   ;;  %v1737_v59 = vld [vmem:[%s3080_s1 + $0x38] sm:$0xff]  }
  0x6a   :  { %924 = vperm.xlu1 %2119, %v132_v61   ;;  %919 = vperm.xlu0 %2118, %v131_v62  }
  0x6e   :  { %934 = vperm.xlu1 %2119, %v134_v63   ;;  %929 = vperm.xlu0 %2118, %v133_v0  }
  0x72   :  { %944 = vperm.xlu1 %2119, %v136_v1   ;;  %939 = vperm.xlu0 %2118, %v135_v2   ;;  %v1698_v1 = vunpack.c.h.bf16 %v1737_v59  ;;  %v1697_v2 = vunpack.c.l.bf16 %v1737_v59 }
  0x76   :  { %954 = vperm.xlu1 %2119, %v138_v3   ;;  %949 = vperm.xlu0 %2118, %v137_v4   ;;  %v1738_v3 = vld [vmem:[%s3080_s1 + $0x40] sm:$0xff]  }
  0x77   :  { %v1702_v9 = vunpack.c.h.bf16 %v1738_v3  ;;  %v1701_v10 = vunpack.c.l.bf16 %v1738_v3 }
  0x7a   :  { %964 = vperm.xlu1 %2119, %v140_v5   ;;  %959 = vperm.xlu0 %2118, %v139_v6  }
  0x7e   :  { %974 = vperm.xlu1 %2119, %v142_v7   ;;  %969 = vperm.xlu0 %2118, %v141_v8  }
  0x81   :  { %v2431_v11 = vpop.permute.xlu1 %219  ;;  %v2433_v12 = vpop.permute.xlu0 %209 }
  0x82   :  { %v369_v22 = vmul.f32 %v1673_v13, %v2431_v11  ;;  %v367_v23 = vmul.f32 %v1669_v14, %v2433_v12  ;;  %v1739_v13 = vld [vmem:[%s3080_s1 + $0x48] sm:$0xff]  }
  0x85   :  { %v2438_v18 = vpop.permute.xlu1 %224  ;;  %v2440_v19 = vpop.permute.xlu0 %214 }
  0x86   :  { %v370_v24 = vmul.f32 %v1674_v15, %v2438_v18  ;;  %v368_v25 = vmul.f32 %v1670_v16, %v2440_v19 }
  0x88   :  { %v400_v27 = vpack.c.bf16 %v370_v24, %v369_v22  ;;  %v399_v28 = vpack.c.bf16 %v368_v25, %v367_v23  ;;  %v1705_v22 = vunpack.c.l.bf16 %v1739_v13  ;;  %v1740_v23 = vld [vmem:[%s3080_s1 + $0x50] sm:$0xff]  }
  0x89   :  { %v2449_v29 = vpop.permute.xlu1 %234  ;;  %v2451_v30 = vpop.permute.xlu0 %229 }
  0x8a   :  { %v372_v31 = vmul.f32 %v1678_v20, %v2449_v29  ;;  %v371_v32 = vmul.f32 %v1677_v21, %v2451_v30  ;;  %2034 = vmatprep.mubr.bf16.mxu1 %v399_v28  ;;  %v1706_v21 = vunpack.c.h.bf16 %v1739_v13  ;;  %v1745_v13 = vld [vmem:[%s3080_s1 + $0x78] sm:$0xff]  }
  0x8b   :  { %2035 = vmatmul.mubr.bf16.vlgmr.msra.gmra.mrb[0].mxu1 %v400_v27 }
  0x8c   :  { %v401_v36 = vpack.c.bf16 %v372_v31, %v371_v32  ;;  %v1710_v31 = vunpack.c.h.bf16 %v1740_v23  ;;  %v1709_v32 = vunpack.c.l.bf16 %v1740_v23  ;;  %v1730_v23 = vunpack.c.h.bf16 %v1745_v13 }
  0x8d   :  { %v2458_v37 = vpop.permute.xlu1 %244  ;;  %v2460_v38 = vpop.permute.xlu0 %239 }
  0x8e   :  { %v374_v39 = vmul.f32 %v1682_v33, %v2458_v37  ;;  %v373_v40 = vmul.f32 %v1681_v34, %v2460_v38  ;;  %2038 = vmatprep.mubr.bf16.mxu1 %v401_v36  ;;  %v1741_v33 = vld [vmem:[%s3080_s1 + $0x58] sm:$0xff]  }
  0x90   :  { %v402_v44 = vpack.c.bf16 %v374_v39, %v373_v40 }
  0x91   :  { %v2467_v45 = vpop.permute.xlu1 %254  ;;  %v2469_v46 = vpop.permute.xlu0 %249 }
  0x92   :  { %v376_v47 = vmul.f32 %v1686_v41, %v2467_v45  ;;  %v375_v48 = vmul.f32 %v1685_v42, %v2469_v46  ;;  %v1714_v41 = vunpack.c.h.bf16 %v1741_v33  ;;  %v1713_v42 = vunpack.c.l.bf16 %v1741_v33 }
  0x93   :  { %2039 = vmatmul.mubr.bf16.gmra.mrb[4].mxu1 %v402_v44 }
  0x94   :  { %v403_v52 = vpack.c.bf16 %v376_v47, %v375_v48 }
  0x95   :  { %v2476_v53 = vpop.permute.xlu1 %264  ;;  %v2478_v54 = vpop.permute.xlu0 %259 }
  0x96   :  { %v378_v55 = vmul.f32 %v1690_v49, %v2476_v53  ;;  %v377_v56 = vmul.f32 %v1689_v50, %v2478_v54  ;;  %2042 = vmatprep.mubr.bf16.mxu1 %v403_v52  ;;  %v1717_v52 = vunpack.c.l.bf16 %v1742_v43 }
  0x98   :  { %v404_v60 = vpack.c.bf16 %v378_v55, %v377_v56  ;;  %v1743_v55 = vld [vmem:[%s3080_s1 + $0x68] sm:$0xff]  }
  0x99   :  { %v2485_v61 = vpop.permute.xlu1 %274  ;;  %v2487_v62 = vpop.permute.xlu0 %269 }
  0x9a   :  { %v380_v63 = vmul.f32 %v1694_v57, %v2485_v61  ;;  %v379_v0 = vmul.f32 %v1693_v58, %v2487_v62 }
  0x9b   :  { %2043 = vmatmul.mubr.bf16.gmra.mrb[8].mxu1 %v404_v60 }
  0x9c   :  { %v405_v4 = vpack.c.bf16 %v380_v63, %v379_v0  ;;  %v1722_v63 = vunpack.c.h.bf16 %v1743_v55  ;;  %v1721_v0 = vunpack.c.l.bf16 %v1743_v55 }
  0x9d   :  { %v2494_v5 = vpop.permute.xlu1 %284  ;;  %v2496_v6 = vpop.permute.xlu0 %279 }
  0x9e   :  { %v382_v7 = vmul.f32 %v1698_v1, %v2494_v5  ;;  %v381_v8 = vmul.f32 %v1697_v2, %v2496_v6  ;;  %2046 = vmatprep.mubr.bf16.mxu1 %v405_v4  ;;  %v1744_v1 = vld [vmem:[%s3080_s1 + $0x70] sm:$0xff]  }
  0xa0   :  { %v406_v14 = vpack.c.bf16 %v382_v7, %v381_v8 }
  0xa1   :  { %v2503_v15 = vpop.permute.xlu1 %294  ;;  %v2505_v16 = vpop.permute.xlu0 %289 }
  0xa2   :  { %v384_v17 = vmul.f32 %v1702_v9, %v2503_v15  ;;  %v383_v20 = vmul.f32 %v1701_v10, %v2505_v16  ;;  %v1726_v9 = vunpack.c.h.bf16 %v1744_v1  ;;  %v1725_v10 = vunpack.c.l.bf16 %v1744_v1 }
  0xa3   :  { %2047 = vmatmul.mubr.bf16.gmra.mrb[12].mxu1 %v406_v14 }
  0xa4   :  { %v407_v24 = vpack.c.bf16 %v384_v17, %v383_v20 }
  0xa5   :  { %v2512_v25 = vpop.permute.xlu1 %304  ;;  %v2514_v26 = vpop.permute.xlu0 %299 }
  0xa6   :  { %v386_v27 = vmul.f32 %v1706_v21, %v2512_v25  ;;  %v385_v28 = vmul.f32 %v1705_v22, %v2514_v26  ;;  %2050 = vmatprep.mubr.bf16.mxu1 %v407_v24  ;;  %v1729_v24 = vunpack.c.l.bf16 %v1745_v13 }
  0xa8   :  { %v408_v34 = vpack.c.bf16 %v386_v27, %v385_v28 }
  0xa9   :  { %v2521_v35 = vpop.permute.xlu1 %314  ;;  %v2523_v36 = vpop.permute.xlu0 %309 }
  0xaa   :  { %v388_v39 = vmul.f32 %v1710_v31, %v2521_v35  ;;  %v387_v40 = vmul.f32 %v1709_v32, %v2523_v36 }
  0xab   :  { %2051 = vmatmul.mubr.bf16.gmra.mrb[16].mxu1 %v408_v34 }
  0xac   :  { %v409_v44 = vpack.c.bf16 %v388_v39, %v387_v40  ;;  %v2572_v39 = vld [vmem:[%s3079_s0 + $0x8] sm:$0xff] }
  0xad   :  { %v2530_v47 = vpop.permute.xlu1 %324  ;;  %v2532_v48 = vpop.permute.xlu0 %319  ;;  %v3119_v40 = vunpack.c.l.s8.bf16 %v2572_v39 }
  0xae   :  { %v390_v49 = vmul.f32 %v1714_v41, %v2530_v47  ;;  %v389_v50 = vmul.f32 %v1713_v42, %v2532_v48  ;;  %2054 = vmatprep.mubr.bf16.mxu1 %v409_v44 }
  0xb0   :  { %v410_v56 = vpack.c.bf16 %v390_v49, %v389_v50 }
  0xb1   :  { %v2539_v57 = vpop.permute.xlu1 %334  ;;  %v2541_v58 = vpop.permute.xlu0 %329 }
  0xb2   :  { %v392_v59 = vmul.f32 %v1718_v51, %v2539_v57  ;;  %v391_v60 = vmul.f32 %v1717_v52, %v2541_v58 }
  0xb3   :  { %2055 = vmatmul.mubr.bf16.gmra.mrb[20].mxu1 %v410_v56 }
  0xb4   :  { %v411_v2 = vpack.c.bf16 %v392_v59, %v391_v60 }
  0xb5   :  { %v2548_v3 = vpop.permute.xlu1 %344  ;;  %v2550_v4 = vpop.permute.xlu0 %339 }
  0xb6   :  { %v394_v7 = vmul.f32 %v1722_v63, %v2548_v3  ;;  %v393_v8 = vmul.f32 %v1721_v0, %v2550_v4  ;;  %2058 = vmatprep.mubr.bf16.mxu1 %v411_v2 }
  0xb8   :  { %v412_v14 = vpack.c.bf16 %v394_v7, %v393_v8 }
  0xb9   :  { %v2557_v17 = vpop.permute.xlu1 %354  ;;  %v2559_v20 = vpop.permute.xlu0 %349 }
  0xba   :  { %v396_v21 = vmul.f32 %v1726_v9, %v2557_v17  ;;  %v395_v22 = vmul.f32 %v1725_v10, %v2559_v20 }
  0xbb   :  { %2059 = vmatmul.mubr.bf16.gmra.mrb[24].mxu1 %v412_v14 }
  0xbc   :  { %v413_v27 = vpack.c.bf16 %v396_v21, %v395_v22 }
  0xbd   :  { %v2563_v28 = vpop.permute.xlu1 %364  ;;  %v2565_v31 = vpop.permute.xlu0 %359 }
  0xbe   :  { %v398_v32 = vmul.f32 %v1730_v23, %v2563_v28  ;;  %v397_v33 = vmul.f32 %v1729_v24, %v2565_v31  ;;  %2062 = vmatprep.mubr.bf16.mxu1 %v413_v27 }
  0xc0   :  { %v414_v34 = vpack.c.bf16 %v398_v32, %v397_v33 }
  0xc3   :  { %2063 = vmatmul.mubr.bf16.gmra.mrb[28].mxu1 %v414_v34 }
  0xc4   :  { %688 = vmatprep.mubr.bf16.mxu1 %v3119_v40 }
 0x15e   :  { %v2036_v41 = vpop.f32.mrb[0].mxu1 }
 0x15f   :  { %v513_v42 = vpop.f32.mrb[1].mxu1 }
 0x160   :  { %v2037_v43 = vpop.f32.mrb[2].mxu1 }
 0x161   :  { %v641_v44 = vpack.c.bf16 %v2037_v43, %v2036_v41  ;;  %v516_v49 = vpop.f32.mrb[3].mxu1 }
 0x162   :  { %v640_v50 = vpack.c.bf16 %v516_v49, %v513_v42 }
 0x166   :  { %v2040_v51 = vpop.f32.mrb[4].mxu1 }
 0x167   :  { %v529_v52 = vpop.f32.mrb[5].mxu1 }
 0x168   :  { %v2041_v55 = vpop.f32.mrb[6].mxu1 }
 0x169   :  { %v643_v56 = vpack.c.bf16 %v2041_v55, %v2040_v51  ;;  %v532_v59 = vpop.f32.mrb[7].mxu1 }
 0x16a   :  { %v642_v60 = vpack.c.bf16 %v532_v59, %v529_v52 }
 0x16e   :  { %v2044_v63 = vpop.f32.mrb[8].mxu1 }
 0x16f   :  { %v545_v0 = vpop.f32.mrb[9].mxu1 }
 0x170   :  { %v2045_v1 = vpop.f32.mrb[10].mxu1 }
 0x171   :  { %v645_v2 = vpack.c.bf16 %v2045_v1, %v2044_v63  ;;  %v548_v7 = vpop.f32.mrb[11].mxu1 }
 0x172   :  { %v644_v8 = vpack.c.bf16 %v548_v7, %v545_v0 }
 0x176   :  { %v2048_v9 = vpop.f32.mrb[12].mxu1 }
 0x177   :  { %v561_v10 = vpop.f32.mrb[13].mxu1 }
 0x178   :  { %v2049_v13 = vpop.f32.mrb[14].mxu1 }
 0x179   :  { %v647_v14 = vpack.c.bf16 %v2049_v13, %v2048_v9  ;;  %v564_v21 = vpop.f32.mrb[15].mxu1 }
 0x17a   :  { %v646_v22 = vpack.c.bf16 %v564_v21, %v561_v10 }
 0x17e   :  { %v2052_v23 = vpop.f32.mrb[16].mxu1 }
 0x17f   :  { %v577_v24 = vpop.f32.mrb[17].mxu1 }
 0x180   :  { %v2053_v27 = vpop.f32.mrb[18].mxu1 }
 0x181   :  { %v649_v32 = vpack.c.bf16 %v2053_v27, %v2052_v23  ;;  %v580_v33 = vpop.f32.mrb[19].mxu1  ;;  %v3117_v23 = vunpack.c.h.s8.bf16 %v2572_v39 }
 0x182   :  { %v648_v34 = vpack.c.bf16 %v580_v33, %v577_v24 }
 0x184   :  { %1770 = vmatprep.subr.bf16.mxu1 %v648_v34  ;;  %v2619_v34 = vld [vmem:[%s3079_s0 + $0x28] sm:$0xff] }
 0x185   :  { %1771 = vmatpush3.bf16.msra.mxu1 %v640_v50 }
 0x186   :  { %v2056_v41 = vpop.f32.mrb[20].mxu1  ;;  %1772 = vmatprep.subr.bf16.mxu1 %v649_v32 }
 0x187   :  { %v593_v42 = vpop.f32.mrb[21].mxu1 }
 0x188   :  { %v2057_v43 = vpop.f32.mrb[22].mxu1 }
 0x189   :  { %v651_v49 = vpack.c.bf16 %v2057_v43, %v2056_v41  ;;  %v596_v51 = vpop.f32.mrb[23].mxu1  ;;  %1773 = vmatpush3.bf16.msra.mxu1 %v641_v44  ;;  %v2630_v43 = vld [vmem:[%s3079_s0 + $0x20] sm:$0xff] }
 0x18a   :  { %v650_v52 = vpack.c.bf16 %v596_v51, %v593_v42  ;;  %v3108_v42 = vunpack.c.l.s8.bf16 %v2619_v34  ;;  %v3106_v51 = vunpack.c.h.s8.bf16 %v2619_v34 }
 0x18c   :  { %1774 = vmatprep.subr.bf16.mxu1 %v650_v52  ;;  %v2641_v52 = vld [vmem:[%s3079_s0 + $0x38] sm:$0xff] }
 0x18d   :  { %1775 = vmatpush3.bf16.msra.mxu1 %v642_v60  ;;  %v2128_v60 = vld [vmem:[%s3083_s4] sm:$0xff]  }
 0x18e   :  { %v2060_v55 = vpop.f32.mrb[24].mxu1  ;;  %1776 = vmatprep.subr.bf16.mxu1 %v651_v49  ;;  %2066 = vmatprep.subr.bf16.mxu0 %v2128_v60  ;;  %v3107_v49 = vunpack.c.l.s8.bf16 %v2630_v43 }
 0x18f   :  { %v609_v59 = vpop.f32.mrb[25].mxu1  ;;  %2067 = vmatpush3.bf16.msra.mxu0 %v2128_v60 }
 0x190   :  { %v2061_v63 = vpop.f32.mrb[26].mxu1 }
 0x191   :  { %v653_v0 = vpack.c.bf16 %v2061_v63, %v2060_v55  ;;  %v612_v1 = vpop.f32.mrb[27].mxu1  ;;  %1777 = vmatpush3.bf16.msra.mxu1 %v643_v56  ;;  %v2129_v56 = vld [vmem:[%s3083_s4 + $0x8] sm:$0xff]   ;;  %v3101_v55 = vunpack.c.h.s8.bf16 %v2630_v43  ;;  %v2652_v63 = vld [vmem:[%s3079_s0 + $0x30] sm:$0xff] }
 0x192   :  { %v652_v7 = vpack.c.bf16 %v612_v1, %v609_v59  ;;  %2068 = vmatprep.subr.bf16.mxu0 %v2129_v56  ;;  %v3098_v59 = vunpack.c.l.s8.bf16 %v2641_v52  ;;  %v3094_v1 = vunpack.c.h.s8.bf16 %v2641_v52 }
 0x193   :  { %2069 = vmatpush3.bf16.msra.mxu0 %v2129_v56 }
 0x194   :  { %1778 = vmatprep.subr.bf16.mxu1 %v652_v7  ;;  %v2663_v7 = vld [vmem:[%s3079_s0 + $0x48] sm:$0xff] }
 0x195   :  { %1779 = vmatpush3.bf16.msra.mxu1 %v644_v8  ;;  %v2586_v8 = vld [vmem:[%s3079_s0] sm:$0xff] }
 0x196   :  { %v2064_v50 = vpop.f32.mrb[28].mxu1  ;;  %1780 = vmatprep.subr.bf16.mxu1 %v653_v0  ;;  %v3116_v24 = vunpack.c.h.s8.bf16 %v2586_v8  ;;  %v3097_v0 = vunpack.c.l.s8.bf16 %v2652_v63 }
 0x197   :  { %v625_v9 = vpop.f32.mrb[29].mxu1 }
 0x198   :  { %v2065_v10 = vpop.f32.mrb[30].mxu1 }
 0x199   :  { %v655_v13 = vpack.c.bf16 %v2065_v10, %v2064_v50  ;;  %v628_v21 = vpop.f32.mrb[31].mxu1  ;;  %1781 = vmatpush3.bf16.msra.mxu1 %v645_v2  ;;  %v3118_v2 = vunpack.c.l.s8.bf16 %v2586_v8  ;;  %v3093_v50 = vunpack.c.h.s8.bf16 %v2652_v63  ;;  %v2674_v10 = vld [vmem:[%s3079_s0 + $0x40] sm:$0xff] }
 0x19a   :  { %v654_v44 = vpack.c.bf16 %v628_v21, %v625_v9  ;;  %v3090_v9 = vunpack.c.l.s8.bf16 %v2663_v7  ;;  %v3089_v21 = vunpack.c.h.s8.bf16 %v2663_v7  ;;  %v3091_v60 = vunpack.c.h.s8.bf16 %v2674_v10 }
 0x19c   :  { %1782 = vmatprep.subr.bf16.mxu1 %v654_v44  ;;  %v2685_v44 = vld [vmem:[%s3079_s0 + $0x58] sm:$0xff] }
 0x19d   :  { %1783 = vmatpush3.bf16.msra.mxu1 %v646_v22  ;;  %v2597_v22 = vld [vmem:[%s3079_s0 + $0x18] sm:$0xff]  ;;  %v3092_v56 = vunpack.c.l.s8.bf16 %v2685_v44 }
 0x19e   :  { %1784 = vmatprep.subr.bf16.mxu1 %v655_v13  ;;  %v3114_v27 = vunpack.c.l.s8.bf16 %v2597_v22  ;;  %v3110_v33 = vunpack.c.h.s8.bf16 %v2597_v22  ;;  %v3088_v13 = vunpack.c.l.s8.bf16 %v2674_v10 }
 0x1a1   :  { %1785 = vmatpush3.bf16.msra.mxu1 %v647_v14  ;;  %v2608_v14 = vld [vmem:[%s3079_s0 + $0x10] sm:$0xff] }
 0x1a2   :  { %v3113_v32 = vunpack.c.l.s8.bf16 %v2608_v14  ;;  %v3109_v41 = vunpack.c.h.s8.bf16 %v2608_v14 }
 0x1a4   :  { %689 = vmatmul.mubr.bf16.vlgmr.msra.gmra.mrb[32].mxu1 %v3118_v2 }
 0x1a5   :  { %696 = vmatprep.mubr.bf16.mxu1 %v3117_v23 }
 0x1ac   :  { %697 = vmatmul.mubr.bf16.gmra.mrb[36].mxu1 %v3116_v24 }
 0x1ad   :  { %704 = vmatprep.mubr.bf16.mxu1 %v3114_v27 }
 0x1b4   :  { %705 = vmatmul.mubr.bf16.gmra.mrb[40].mxu1 %v3113_v32  ;;  %v2777_v32 = vpop.permute.xlu1 %824 }
 0x1b5   :  { %712 = vmatprep.mubr.bf16.mxu1 %v3110_v33  ;;  %v2774_v33 = vld [vmem:[%s3082_s3] ss:$0 sm:$0xff]  ;;  %3138 = vst [vmem:[#allocation10_spill] sm:$0xff] %v2777_v32 }
 0x1bc   :  { %713 = vmatmul.mubr.bf16.gmra.mrb[44].mxu1 %v3109_v41 }
 0x1bd   :  { %720 = vmatprep.mubr.bf16.mxu1 %v3108_v42  ;;  %v2769_v42 = vpop.permute.xlu0 %819 }
 0x1be   :  { %3137 = vst [vmem:[#allocation9_spill] sm:$0xff] %v2769_v42 }
 0x1c4   :  { %721 = vmatmul.mubr.bf16.gmra.mrb[48].mxu1 %v3107_v49 }
 0x1c5   :  { %728 = vmatprep.mubr.bf16.mxu1 %v3106_v51 }
 0x1cc   :  { %729 = vmatmul.mubr.bf16.gmra.mrb[52].mxu1 %v3101_v55 }
 0x1cd   :  { %736 = vmatprep.mubr.bf16.mxu1 %v3098_v59 }
 0x1d4   :  { %737 = vmatmul.mubr.bf16.gmra.mrb[56].mxu1 %v3097_v0 }
 0x1d5   :  { %744 = vmatprep.mubr.bf16.mxu1 %v3094_v1 }
 0x1dc   :  { %745 = vmatmul.mubr.bf16.gmra.mrb[60].mxu1 %v3093_v50 }
 0x1dd   :  { %752 = vmatprep.mubr.bf16.mxu1 %v3090_v9  ;;  %v3096_v9 = vunpack.c.h.s8.bf16 %v2685_v44 }
 0x1e4   :  { %753 = vmatmul.mubr.bf16.gmra.mrb[64].mxu1 %v3088_v13  ;;  %v2696_v13 = vld [vmem:[%s3079_s0 + $0x50] sm:$0xff] }
 0x1e5   :  { %760 = vmatprep.mubr.bf16.mxu1 %v3089_v21  ;;  %v3095_v21 = vunpack.c.l.s8.bf16 %v2696_v13  ;;  %v3100_v50 = vunpack.c.h.s8.bf16 %v2696_v13 }
 0x1ec   :  { %761 = vmatmul.mubr.bf16.gmra.mrb[68].mxu1 %v3091_v60  ;;  %v2130_v60 = vld [vmem:[%s3083_s4 + $0x10] sm:$0xff]  }
 0x1ed   :  { %768 = vmatprep.mubr.bf16.mxu1 %v3092_v56  ;;  %v2710_v56 = vld [vmem:[%s3079_s0 + $0x68] sm:$0xff]  ;;  %2070 = vmatprep.subr.bf16.mxu0 %v2130_v60 }
 0x1ee   :  { %3133 = vst [vmem:[#allocation5_spill] sm:$0xff] %v2710_v56  ;;  %2071 = vmatpush3.bf16.msra.mxu0 %v2130_v60  ;;  %v3099_v1 = vunpack.c.l.s8.bf16 %v2710_v56  ;;  %v2132_v60 = vld [vmem:[%s3083_s4 + $0x20] sm:$0xff]   ;;  %v3102_v59 = vunpack.c.h.s8.bf16 %v2710_v56 }
 0x1f4   :  { %769 = vmatmul.mubr.bf16.gmra.mrb[72].mxu1 %v3095_v21  ;;  %v2131_v21 = vld [vmem:[%s3083_s4 + $0x18] sm:$0xff]  }
 0x1f5   :  { %776 = vmatprep.mubr.bf16.mxu1 %v3096_v9  ;;  %2072 = vmatprep.subr.bf16.mxu0 %v2131_v21  ;;  %v2724_v9 = vld [vmem:[%s3079_s0 + $0x60] sm:$0xff] }
 0x1f6   :  { %2073 = vmatpush3.bf16.msra.mxu0 %v2131_v21  ;;  %3134 = vst [vmem:[#allocation6_spill] sm:$0xff] %v2724_v9  ;;  %v3103_v0 = vunpack.c.l.s8.bf16 %v2724_v9  ;;  %v2133_v21 = vld [vmem:[%s3083_s4 + $0x28] sm:$0xff]  }
 0x1f7   :  { %2074 = vmatprep.subr.bf16.mxu0 %v2132_v60 }
 0x1fa   :  { %2075 = vmatpush3.bf16.msra.mxu0 %v2132_v60  ;;  %v2744_v60 = vld [vmem:[%s3079_s0 + $0x78] sm:$0xff] }
 0x1fb   :  { %2076 = vmatprep.subr.bf16.mxu0 %v2133_v21  ;;  %3135 = vst [vmem:[#allocation7_spill] sm:$0xff] %v2744_v60  ;;  %v3104_v55 = vunpack.c.l.s8.bf16 %v2744_v60 }
 0x1fc   :  { %777 = vmatmul.mubr.bf16.gmra.mrb[76].mxu1 %v3100_v50  ;;  %v3105_v50 = vunpack.c.h.s8.bf16 %v2724_v9 }
 0x1fd   :  { %784 = vmatprep.mubr.bf16.mxu1 %v3099_v1  ;;  %v2134_v1 = vld [vmem:[%s3083_s4 + $0x30] sm:$0xff]  }
 0x1fe   :  { %2077 = vmatpush3.bf16.msra.mxu0 %v2133_v21  ;;  %v2135_v21 = vld [vmem:[%s3083_s4 + $0x38] sm:$0xff]  }
 0x1ff   :  { %2078 = vmatprep.subr.bf16.mxu0 %v2134_v1 }
 0x202   :  { %2079 = vmatpush3.bf16.msra.mxu0 %v2134_v1 }
 0x203   :  { %2080 = vmatprep.subr.bf16.mxu0 %v2135_v21 }
 0x204   :  { %785 = vmatmul.mubr.bf16.gmra.mrb[80].mxu1 %v3103_v0  ;;  %v3112_v0 = vunpack.c.h.s8.bf16 %v2744_v60  ;;  %v2782_v60 = vpop.permute.xlu0 %829 }
 0x205   :  { %792 = vmatprep.mubr.bf16.mxu1 %v3102_v59  ;;  %v2758_v59 = vld [vmem:[%s3079_s0 + $0x70] sm:$0xff] }
 0x206   :  { %2081 = vmatpush3.bf16.msra.mxu0 %v2135_v21  ;;  %3136 = vst [vmem:[#allocation8_spill] sm:$0xff] %v2758_v59  ;;  %v3111_v1 = vunpack.c.l.s8.bf16 %v2758_v59  ;;  %v3115_v21 = vunpack.c.h.s8.bf16 %v2758_v59 }
 0x20c   :  { %793 = vmatmul.mubr.bf16.gmra.mrb[84].mxu1 %v3105_v50 }
 0x20d   :  { %800 = vmatprep.mubr.bf16.mxu1 %v3104_v55 }
 0x214   :  { %801 = vmatmul.mubr.bf16.gmra.mrb[88].mxu1 %v3111_v1 }
 0x215   :  { %808 = vmatprep.mubr.bf16.mxu1 %v3112_v0 }
 0x21c   :  { %809 = vmatmul.mubr.bf16.gmra.mrb[92].mxu1 %v3115_v21 }
 0x277   :  { %v1786_v55 = vpop.f32.mrb[32].mxu1 }
 0x278   :  { %v1787_v50 = vpop.f32.mrb[33].mxu1 }
 0x279   :  { %v1788_v51 = vadd.f32 %v1787_v50, %v1786_v55  ;;  %v1789_v49 = vpop.f32.mrb[34].mxu1 }
 0x27a   :  { %v1790_v41 = vpop.f32.mrb[35].mxu1 }
 0x27b   :  { %v977_v1 = vmul.f32 %v1788_v51, %v2769_v42  ;;  %v1791_v0 = vadd.f32 %v1790_v41, %v1789_v49 }
 0x27d   :  { %v978_v27 = vmul.f32 %v1791_v0, %v2777_v32  ;;  %v1016_v21 = vadd.f32 %v2774_v33, %v977_v1  ;;  %v2787_v32 = vpop.permute.xlu1 %834 }
 0x27f   :  { %v1792_v24 = vpop.f32.mrb[36].mxu1  ;;  %v1017_v55 = vadd.f32 %v2774_v33, %v978_v27  ;;  %v1048_v50 = vmax.f32 %v1016_v21, 0.0 }
 0x280   :  { %v1793_v23 = vpop.f32.mrb[37].mxu1 }
 0x281   :  { %v1794_v2 = vadd.f32 %v1793_v23, %v1792_v24  ;;  %v1795_v40 = vpop.f32.mrb[38].mxu1  ;;  %v1049_v59 = vmax.f32 %v1017_v55, 0.0  ;;  %v1080_v49 = vmul.f32 %v1048_v50, %v2433_v12 }
 0x282   :  { %v1796_v9 = vpop.f32.mrb[39].mxu1 }
 0x283   :  { %v979_v51 = vmul.f32 %v1794_v2, %v2782_v60  ;;  %v1797_v41 = vadd.f32 %v1796_v9, %v1795_v40  ;;  %v1081_v0 = vmul.f32 %v1049_v59, %v2440_v19  ;;  %v2792_v9 = vpop.permute.xlu0 %839 }
 0x285   :  { %v1018_v1 = vadd.f32 %v2774_v33, %v979_v51  ;;  %v980_v27 = vmul.f32 %v1797_v41, %v2787_v32  ;;  %v1112_v21 = vpack.c.bf16 %v1081_v0, %v1080_v49  ;;  %v2797_v41 = vpop.permute.xlu1 %844 }
 0x287   :  { %v1050_v23 = vmax.f32 %v1018_v1, 0.0  ;;  %v1019_v24 = vadd.f32 %v2774_v33, %v980_v27  ;;  %v1798_v55 = vpop.f32.mrb[40].mxu1  ;;  %2082 = vmatprep.mubr.bf16.mxu0 %v1112_v21 }
 0x288   :  { %v1799_v42 = vpop.f32.mrb[41].mxu1 }
 0x289   :  { %v1051_v56 = vmax.f32 %v1019_v24, 0.0  ;;  %v1800_v2 = vadd.f32 %v1799_v42, %v1798_v55  ;;  %v1801_v40 = vpop.f32.mrb[42].mxu1  ;;  %v1082_v50 = vmul.f32 %v1050_v23, %v2431_v11 }
 0x28a   :  { %v1802_v12 = vpop.f32.mrb[43].mxu1 }
 0x28b   :  { %v981_v19 = vmul.f32 %v1800_v2, %v2792_v9  ;;  %v1803_v59 = vadd.f32 %v1802_v12, %v1801_v40  ;;  %v1083_v51 = vmul.f32 %v1051_v56, %v2438_v18  ;;  %v2802_v12 = vpop.permute.xlu0 %849 }
 0x28d   :  { %v1020_v49 = vadd.f32 %v2774_v33, %v981_v19  ;;  %v982_v0 = vmul.f32 %v1803_v59, %v2797_v41  ;;  %v1113_v1 = vpack.c.bf16 %v1083_v51, %v1082_v50  ;;  %v2807_v59 = vpop.permute.xlu1 %854 }
 0x28f   :  { %v1052_v27 = vmax.f32 %v1020_v49, 0.0  ;;  %v1021_v42 = vadd.f32 %v2774_v33, %v982_v0  ;;  %v1804_v21 = vpop.f32.mrb[44].mxu1  ;;  %2083 = vmatmul.mubr.bf16.vlgmr.msra.gmra.mrb[0].mxu0 %v1113_v1 }
 0x290   :  { %v1805_v24 = vpop.f32.mrb[45].mxu1 }
 0x291   :  { %v1053_v55 = vmax.f32 %v1021_v42, 0.0  ;;  %v1806_v2 = vadd.f32 %v1805_v24, %v1804_v21  ;;  %v1807_v40 = vpop.f32.mrb[46].mxu1  ;;  %v1084_v23 = vmul.f32 %v1052_v27, %v2451_v30 }
 0x292   :  { %v1808_v11 = vpop.f32.mrb[47].mxu1 }
 0x293   :  { %v983_v18 = vmul.f32 %v1806_v2, %v2802_v12  ;;  %v1809_v56 = vadd.f32 %v1808_v11, %v1807_v40  ;;  %v1085_v19 = vmul.f32 %v1053_v55, %v2449_v29  ;;  %v2812_v11 = vpop.permute.xlu0 %859 }
 0x295   :  { %v1022_v50 = vadd.f32 %v2774_v33, %v983_v18  ;;  %v984_v51 = vmul.f32 %v1809_v56, %v2807_v59  ;;  %v1114_v49 = vpack.c.bf16 %v1085_v19, %v1084_v23  ;;  %v2817_v56 = vpop.permute.xlu1 %864 }
 0x297   :  { %v1054_v0 = vmax.f32 %v1022_v50, 0.0  ;;  %v1023_v1 = vadd.f32 %v2774_v33, %v984_v51  ;;  %v1810_v42 = vpop.f32.mrb[48].mxu1  ;;  %2086 = vmatprep.mubr.bf16.mxu0 %v1114_v49 }
 0x298   :  { %v1811_v21 = vpop.f32.mrb[49].mxu1 }
 0x299   :  { %v1055_v24 = vmax.f32 %v1023_v1, 0.0  ;;  %v1812_v2 = vadd.f32 %v1811_v21, %v1810_v42  ;;  %v1813_v40 = vpop.f32.mrb[50].mxu1  ;;  %v1086_v55 = vmul.f32 %v1054_v0, %v2460_v38 }
 0x29a   :  { %v1814_v30 = vpop.f32.mrb[51].mxu1 }
 0x29b   :  { %v985_v29 = vmul.f32 %v1812_v2, %v2812_v11  ;;  %v1815_v27 = vadd.f32 %v1814_v30, %v1813_v40  ;;  %v1087_v18 = vmul.f32 %v1055_v24, %v2458_v37  ;;  %v2822_v30 = vpop.permute.xlu0 %869 }
 0x29d   :  { %v1024_v23 = vadd.f32 %v2774_v33, %v985_v29  ;;  %v986_v19 = vmul.f32 %v1815_v27, %v2817_v56  ;;  %v1115_v50 = vpack.c.bf16 %v1087_v18, %v1086_v55  ;;  %v2827_v27 = vpop.permute.xlu1 %874 }
 0x29f   :  { %v1056_v51 = vmax.f32 %v1024_v23, 0.0  ;;  %v1025_v49 = vadd.f32 %v2774_v33, %v986_v19  ;;  %v1816_v1 = vpop.f32.mrb[52].mxu1  ;;  %2087 = vmatmul.mubr.bf16.gmra.mrb[4].mxu0 %v1115_v50 }
 0x2a0   :  { %v1817_v42 = vpop.f32.mrb[53].mxu1 }
 0x2a1   :  { %v1057_v21 = vmax.f32 %v1025_v49, 0.0  ;;  %v1818_v2 = vadd.f32 %v1817_v42, %v1816_v1  ;;  %v1819_v40 = vpop.f32.mrb[54].mxu1  ;;  %v1088_v24 = vmul.f32 %v1056_v51, %v2469_v46 }
 0x2a2   :  { %v1820_v38 = vpop.f32.mrb[55].mxu1 }
 0x2a3   :  { %v987_v37 = vmul.f32 %v1818_v2, %v2822_v30  ;;  %v1821_v0 = vadd.f32 %v1820_v38, %v1819_v40  ;;  %v1089_v29 = vmul.f32 %v1057_v21, %v2467_v45  ;;  %v2832_v38 = vpop.permute.xlu0 %879 }
 0x2a5   :  { %v1026_v55 = vadd.f32 %v2774_v33, %v987_v37  ;;  %v988_v18 = vmul.f32 %v1821_v0, %v2827_v27  ;;  %v1116_v23 = vpack.c.bf16 %v1089_v29, %v1088_v24  ;;  %v2837_v0 = vpop.permute.xlu1 %884 }
 0x2a7   :  { %v1058_v19 = vmax.f32 %v1026_v55, 0.0  ;;  %v1027_v50 = vadd.f32 %v2774_v33, %v988_v18  ;;  %v1822_v49 = vpop.f32.mrb[56].mxu1  ;;  %2090 = vmatprep.mubr.bf16.mxu0 %v1116_v23 }
 0x2a8   :  { %v1823_v1 = vpop.f32.mrb[57].mxu1 }
 0x2a9   :  { %v1059_v42 = vmax.f32 %v1027_v50, 0.0  ;;  %v1824_v2 = vadd.f32 %v1823_v1, %v1822_v49  ;;  %v1825_v40 = vpop.f32.mrb[58].mxu1  ;;  %v1090_v21 = vmul.f32 %v1058_v19, %v2478_v54 }
 0x2aa   :  { %v1826_v46 = vpop.f32.mrb[59].mxu1 }
 0x2ab   :  { %v989_v45 = vmul.f32 %v1824_v2, %v2832_v38  ;;  %v1827_v51 = vadd.f32 %v1826_v46, %v1825_v40  ;;  %v1091_v37 = vmul.f32 %v1059_v42, %v2476_v53  ;;  %v2842_v46 = vpop.permute.xlu0 %889 }
 0x2ad   :  { %v1028_v24 = vadd.f32 %v2774_v33, %v989_v45  ;;  %v990_v29 = vmul.f32 %v1827_v51, %v2837_v0  ;;  %v1117_v55 = vpack.c.bf16 %v1091_v37, %v1090_v21  ;;  %v2847_v51 = vpop.permute.xlu1 %894 }
 0x2af   :  { %v1060_v18 = vmax.f32 %v1028_v24, 0.0  ;;  %v1029_v23 = vadd.f32 %v2774_v33, %v990_v29  ;;  %v1828_v50 = vpop.f32.mrb[60].mxu1  ;;  %2091 = vmatmul.mubr.bf16.gmra.mrb[8].mxu0 %v1117_v55 }
 0x2b0   :  { %v1829_v49 = vpop.f32.mrb[61].mxu1 }
 0x2b1   :  { %v1061_v1 = vmax.f32 %v1029_v23, 0.0  ;;  %v1830_v2 = vadd.f32 %v1829_v49, %v1828_v50  ;;  %v1831_v40 = vpop.f32.mrb[62].mxu1  ;;  %v1092_v42 = vmul.f32 %v1060_v18, %v2487_v62 }
 0x2b2   :  { %v1832_v54 = vpop.f32.mrb[63].mxu1 }
 0x2b3   :  { %v991_v53 = vmul.f32 %v1830_v2, %v2842_v46  ;;  %v1833_v19 = vadd.f32 %v1832_v54, %v1831_v40  ;;  %v1093_v45 = vmul.f32 %v1061_v1, %v2485_v61  ;;  %v2852_v54 = vpop.permute.xlu0 %899 }
 0x2b5   :  { %v1030_v21 = vadd.f32 %v2774_v33, %v991_v53  ;;  %v992_v37 = vmul.f32 %v1833_v19, %v2847_v51  ;;  %v1118_v24 = vpack.c.bf16 %v1093_v45, %v1092_v42  ;;  %v2857_v19 = vpop.permute.xlu1 %904 }
 0x2b7   :  { %v1062_v29 = vmax.f32 %v1030_v21, 0.0  ;;  %v1031_v55 = vadd.f32 %v2774_v33, %v992_v37  ;;  %v1834_v23 = vpop.f32.mrb[64].mxu1  ;;  %2094 = vmatprep.mubr.bf16.mxu0 %v1118_v24 }
 0x2b8   :  { %v1835_v50 = vpop.f32.mrb[65].mxu1 }
 0x2b9   :  { %v1063_v49 = vmax.f32 %v1031_v55, 0.0  ;;  %v1836_v2 = vadd.f32 %v1835_v50, %v1834_v23  ;;  %v1837_v40 = vpop.f32.mrb[66].mxu1  ;;  %v1094_v1 = vmul.f32 %v1062_v29, %v2496_v6 }
 0x2ba   :  { %v1838_v62 = vpop.f32.mrb[67].mxu1 }
 0x2bb   :  { %v993_v61 = vmul.f32 %v1836_v2, %v2852_v54  ;;  %v1839_v18 = vadd.f32 %v1838_v62, %v1837_v40  ;;  %v1095_v53 = vmul.f32 %v1063_v49, %v2494_v5  ;;  %v2862_v62 = vpop.permute.xlu0 %909 }
 0x2bd   :  { %v1032_v42 = vadd.f32 %v2774_v33, %v993_v61  ;;  %v994_v45 = vmul.f32 %v1839_v18, %v2857_v19  ;;  %v1119_v21 = vpack.c.bf16 %v1095_v53, %v1094_v1  ;;  %v2867_v18 = vpop.permute.xlu1 %914 }
 0x2bf   :  { %v1064_v37 = vmax.f32 %v1032_v42, 0.0  ;;  %v1033_v24 = vadd.f32 %v2774_v33, %v994_v45  ;;  %v1840_v55 = vpop.f32.mrb[68].mxu1  ;;  %2095 = vmatmul.mubr.bf16.gmra.mrb[12].mxu0 %v1119_v21 }
 0x2c0   :  { %v1841_v23 = vpop.f32.mrb[69].mxu1 }
 0x2c1   :  { %v1065_v50 = vmax.f32 %v1033_v24, 0.0  ;;  %v1842_v2 = vadd.f32 %v1841_v23, %v1840_v55  ;;  %v1843_v40 = vpop.f32.mrb[70].mxu1  ;;  %v1096_v49 = vmul.f32 %v1064_v37, %v2505_v16 }
 0x2c2   :  { %v1844_v6 = vpop.f32.mrb[71].mxu1 }
 0x2c3   :  { %v995_v5 = vmul.f32 %v1842_v2, %v2862_v62  ;;  %v1845_v29 = vadd.f32 %v1844_v6, %v1843_v40  ;;  %v1097_v61 = vmul.f32 %v1065_v50, %v2503_v15  ;;  %v2872_v6 = vpop.permute.xlu0 %919 }
 0x2c5   :  { %v1034_v1 = vadd.f32 %v2774_v33, %v995_v5  ;;  %v996_v53 = vmul.f32 %v1845_v29, %v2867_v18  ;;  %v1120_v42 = vpack.c.bf16 %v1097_v61, %v1096_v49  ;;  %v2877_v29 = vpop.permute.xlu1 %924 }
 0x2c7   :  { %v1066_v45 = vmax.f32 %v1034_v1, 0.0  ;;  %v1035_v21 = vadd.f32 %v2774_v33, %v996_v53  ;;  %v1846_v24 = vpop.f32.mrb[72].mxu1  ;;  %2098 = vmatprep.mubr.bf16.mxu0 %v1120_v42 }
 0x2c8   :  { %v1847_v55 = vpop.f32.mrb[73].mxu1 }
 0x2c9   :  { %v1067_v23 = vmax.f32 %v1035_v21, 0.0  ;;  %v1848_v2 = vadd.f32 %v1847_v55, %v1846_v24  ;;  %v1849_v40 = vpop.f32.mrb[74].mxu1  ;;  %v1098_v50 = vmul.f32 %v1066_v45, %v2514_v26 }
 0x2ca   :  { %v1850_v16 = vpop.f32.mrb[75].mxu1 }
 0x2cb   :  { %v997_v15 = vmul.f32 %v1848_v2, %v2872_v6  ;;  %v1851_v37 = vadd.f32 %v1850_v16, %v1849_v40  ;;  %v1099_v5 = vmul.f32 %v1067_v23, %v2512_v25  ;;  %v2882_v16 = vpop.permute.xlu0 %929 }
 0x2cd   :  { %v1036_v49 = vadd.f32 %v2774_v33, %v997_v15  ;;  %v998_v61 = vmul.f32 %v1851_v37, %v2877_v29  ;;  %v1121_v1 = vpack.c.bf16 %v1099_v5, %v1098_v50  ;;  %v2887_v37 = vpop.permute.xlu1 %934 }
 0x2cf   :  { %v1068_v53 = vmax.f32 %v1036_v49, 0.0  ;;  %v1037_v42 = vadd.f32 %v2774_v33, %v998_v61  ;;  %v1852_v21 = vpop.f32.mrb[76].mxu1  ;;  %2099 = vmatmul.mubr.bf16.gmra.mrb[16].mxu0 %v1121_v1 }
 0x2d0   :  { %v1853_v24 = vpop.f32.mrb[77].mxu1 }
 0x2d1   :  { %v1069_v55 = vmax.f32 %v1037_v42, 0.0  ;;  %v1854_v2 = vadd.f32 %v1853_v24, %v1852_v21  ;;  %v1855_v40 = vpop.f32.mrb[78].mxu1  ;;  %v1100_v23 = vmul.f32 %v1068_v53, %v2523_v36 }
 0x2d2   :  { %v1856_v26 = vpop.f32.mrb[79].mxu1 }
 0x2d3   :  { %v999_v25 = vmul.f32 %v1854_v2, %v2882_v16  ;;  %v1857_v45 = vadd.f32 %v1856_v26, %v1855_v40  ;;  %v1101_v15 = vmul.f32 %v1069_v55, %v2521_v35  ;;  %v2892_v26 = vpop.permute.xlu0 %939 }
 0x2d5   :  { %v1038_v50 = vadd.f32 %v2774_v33, %v999_v25  ;;  %v1000_v5 = vmul.f32 %v1857_v45, %v2887_v37  ;;  %v1122_v49 = vpack.c.bf16 %v1101_v15, %v1100_v23  ;;  %v2897_v45 = vpop.permute.xlu1 %944 }
 0x2d7   :  { %v1070_v61 = vmax.f32 %v1038_v50, 0.0  ;;  %v1039_v1 = vadd.f32 %v2774_v33, %v1000_v5  ;;  %v1858_v42 = vpop.f32.mrb[80].mxu1  ;;  %2102 = vmatprep.mubr.bf16.mxu0 %v1122_v49 }
 0x2d8   :  { %v1859_v21 = vpop.f32.mrb[81].mxu1 }
 0x2d9   :  { %v1071_v24 = vmax.f32 %v1039_v1, 0.0  ;;  %v1860_v2 = vadd.f32 %v1859_v21, %v1858_v42  ;;  %v1861_v40 = vpop.f32.mrb[82].mxu1  ;;  %v1102_v55 = vmul.f32 %v1070_v61, %v2532_v48 }
 0x2da   :  { %v1862_v36 = vpop.f32.mrb[83].mxu1 }
 0x2db   :  { %v1001_v35 = vmul.f32 %v1860_v2, %v2892_v26  ;;  %v1863_v53 = vadd.f32 %v1862_v36, %v1861_v40  ;;  %v1103_v25 = vmul.f32 %v1071_v24, %v2530_v47  ;;  %v2902_v36 = vpop.permute.xlu0 %949 }
 0x2dd   :  { %v1040_v23 = vadd.f32 %v2774_v33, %v1001_v35  ;;  %v1002_v15 = vmul.f32 %v1863_v53, %v2897_v45  ;;  %v1123_v50 = vpack.c.bf16 %v1103_v25, %v1102_v55  ;;  %v2907_v53 = vpop.permute.xlu1 %954 }
 0x2df   :  { %v1072_v5 = vmax.f32 %v1040_v23, 0.0  ;;  %v1041_v49 = vadd.f32 %v2774_v33, %v1002_v15  ;;  %v1864_v1 = vpop.f32.mrb[84].mxu1  ;;  %2103 = vmatmul.mubr.bf16.gmra.mrb[20].mxu0 %v1123_v50 }
 0x2e0   :  { %v1865_v42 = vpop.f32.mrb[85].mxu1 }
 0x2e1   :  { %v1073_v21 = vmax.f32 %v1041_v49, 0.0  ;;  %v1866_v2 = vadd.f32 %v1865_v42, %v1864_v1  ;;  %v1867_v40 = vpop.f32.mrb[86].mxu1  ;;  %v1104_v24 = vmul.f32 %v1072_v5, %v2541_v58 }
 0x2e2   :  { %v1868_v48 = vpop.f32.mrb[87].mxu1 }
 0x2e3   :  { %v1003_v47 = vmul.f32 %v1866_v2, %v2902_v36  ;;  %v1869_v61 = vadd.f32 %v1868_v48, %v1867_v40  ;;  %v1105_v35 = vmul.f32 %v1073_v21, %v2539_v57  ;;  %v2912_v48 = vpop.permute.xlu0 %959 }
 0x2e5   :  { %v1042_v55 = vadd.f32 %v2774_v33, %v1003_v47  ;;  %v1004_v25 = vmul.f32 %v1869_v61, %v2907_v53  ;;  %v1124_v23 = vpack.c.bf16 %v1105_v35, %v1104_v24  ;;  %v2917_v61 = vpop.permute.xlu1 %964 }
 0x2e6   :  { %3139 = vst [vmem:[#allocation11_spill] sm:$0xff] %v2917_v61 }
 0x2e7   :  { %v1074_v15 = vmax.f32 %v1042_v55, 0.0  ;;  %v1043_v50 = vadd.f32 %v2774_v33, %v1004_v25  ;;  %v1870_v49 = vpop.f32.mrb[88].mxu1  ;;  %2106 = vmatprep.mubr.bf16.mxu0 %v1124_v23 }
 0x2e8   :  { %v1871_v1 = vpop.f32.mrb[89].mxu1 }
 0x2e9   :  { %v1075_v42 = vmax.f32 %v1043_v50, 0.0  ;;  %v1872_v2 = vadd.f32 %v1871_v1, %v1870_v49  ;;  %v1873_v40 = vpop.f32.mrb[90].mxu1  ;;  %v1106_v21 = vmul.f32 %v1074_v15, %v2550_v4 }
 0x2ea   :  { %v1874_v58 = vpop.f32.mrb[91].mxu1 }
 0x2eb   :  { %v1005_v57 = vmul.f32 %v1872_v2, %v2912_v48  ;;  %v1875_v5 = vadd.f32 %v1874_v58, %v1873_v40  ;;  %v1107_v47 = vmul.f32 %v1075_v42, %v2548_v3  ;;  %v2922_v58 = vpop.permute.xlu0 %969 }
 0x2ec   :  { %3140 = vst [vmem:[#allocation12_spill] sm:$0xff] %v2922_v58 }
 0x2ed   :  { %v1044_v24 = vadd.f32 %v2774_v33, %v1005_v57  ;;  %v1006_v35 = vmul.f32 %v1875_v5, %v2917_v61  ;;  %v1125_v55 = vpack.c.bf16 %v1107_v47, %v1106_v21  ;;  %v2927_v5 = vpop.permute.xlu1 %974 }
 0x2ee   :  { %3141 = vst [vmem:[#allocation13_spill] sm:$0xff] %v2927_v5 }
 0x2ef   :  { %v1076_v25 = vmax.f32 %v1044_v24, 0.0  ;;  %v1045_v23 = vadd.f32 %v2774_v33, %v1006_v35  ;;  %v1876_v50 = vpop.f32.mrb[92].mxu1  ;;  %2107 = vmatmul.mubr.bf16.gmra.mrb[24].mxu0 %v1125_v55 }
 0x2f0   :  { %v1877_v49 = vpop.f32.mrb[93].mxu1 }
 0x2f1   :  { %v1077_v1 = vmax.f32 %v1045_v23, 0.0  ;;  %v1878_v2 = vadd.f32 %v1877_v49, %v1876_v50  ;;  %v1879_v40 = vpop.f32.mrb[94].mxu1  ;;  %v1108_v42 = vmul.f32 %v1076_v25, %v2559_v20 }
 0x2f2   :  { %v1880_v4 = vpop.f32.mrb[95].mxu1 }
 0x2f3   :  { %v1007_v3 = vmul.f32 %v1878_v2, %v2922_v58  ;;  %v1881_v15 = vadd.f32 %v1880_v4, %v1879_v40  ;;  %v1109_v57 = vmul.f32 %v1077_v1, %v2557_v17  ;;  %v3142_v17 = vunpack.c.l.s8.bf16 %v2572_v39 }
 0x2f5   :  { %v1046_v21 = vadd.f32 %v2774_v33, %v1007_v3  ;;  %v1008_v47 = vmul.f32 %v1881_v15, %v2927_v5  ;;  %v1126_v24 = vpack.c.bf16 %v1109_v57, %v1108_v42 }
 0x2f7   :  { %v1078_v35 = vmax.f32 %v1046_v21, 0.0  ;;  %v1047_v55 = vadd.f32 %v2774_v33, %v1008_v47  ;;  %2110 = vmatprep.mubr.bf16.mxu0 %v1126_v24 }
 0x2f9   :  { %v1079_v23 = vmax.f32 %v1047_v55, 0.0  ;;  %v1110_v50 = vmul.f32 %v1078_v35, %v2565_v31 }
 0x2fb   :  { %v1111_v49 = vmul.f32 %v1079_v23, %v2563_v28 }
 0x2fd   :  { %v1127_v2 = vpack.c.bf16 %v1111_v49, %v1110_v50 }
 0x2ff   :  { %2111 = vmatmul.mubr.bf16.gmra.mrb[28].mxu0 %v1127_v2 }
 0x300   :  { %1401 = vmatprep.mubr.bf16.mxu0 %v3142_v17 }
 0x362   :  { %v2084_v20 = vpop.f32.mrb[0].mxu0 }
 0x363   :  { %v1226_v25 = vpop.f32.mrb[1].mxu0 }
 0x364   :  { %v2085_v1 = vpop.f32.mrb[2].mxu0 }
 0x365   :  { %v1354_v40 = vpack.c.bf16 %v2085_v1, %v2084_v20  ;;  %v1229_v4 = vpop.f32.mrb[3].mxu0 }
 0x366   :  { %v1353_v3 = vpack.c.bf16 %v1229_v4, %v1226_v25 }
 0x372   :  { %v2088_v15 = vpop.f32.mrb[4].mxu0 }
 0x373   :  { %v1242_v42 = vpop.f32.mrb[5].mxu0 }
 0x374   :  { %v2089_v33 = vpop.f32.mrb[6].mxu0 }
 0x375   :  { %v1356_v57 = vpack.c.bf16 %v2089_v33, %v2088_v15  ;;  %v1245_v21 = vpop.f32.mrb[7].mxu0 }
 0x376   :  { %v1355_v47 = vpack.c.bf16 %v1245_v21, %v1242_v42 }
 0x382   :  { %v2092_v31 = vpop.f32.mrb[8].mxu0 }
 0x383   :  { %v1258_v24 = vpop.f32.mrb[9].mxu0 }
 0x384   :  { %v2093_v28 = vpop.f32.mrb[10].mxu0 }
 0x385   :  { %v1358_v35 = vpack.c.bf16 %v2093_v28, %v2092_v31  ;;  %v1261_v55 = vpop.f32.mrb[11].mxu0 }
 0x386   :  { %v1357_v23 = vpack.c.bf16 %v1261_v55, %v1258_v24 }
 0x392   :  { %v2096_v50 = vpop.f32.mrb[12].mxu0 }
 0x393   :  { %v1274_v49 = vpop.f32.mrb[13].mxu0 }
 0x394   :  { %v2097_v2 = vpop.f32.mrb[14].mxu0 }
 0x395   :  { %v1360_v17 = vpack.c.bf16 %v2097_v2, %v2096_v50  ;;  %v1277_v5 = vpop.f32.mrb[15].mxu0 }
 0x396   :  { %v1359_v20 = vpack.c.bf16 %v1277_v5, %v1274_v49 }
 0x3a2   :  { %v2100_v1 = vpop.f32.mrb[16].mxu0 }
 0x3a3   :  { %v1290_v25 = vpop.f32.mrb[17].mxu0 }
 0x3a4   :  { %v2101_v4 = vpop.f32.mrb[18].mxu0 }
 0x3a5   :  { %v1362_v58 = vpack.c.bf16 %v2101_v4, %v2100_v1  ;;  %v1293_v61 = vpop.f32.mrb[19].mxu0 }
 0x3a6   :  { %v1361_v15 = vpack.c.bf16 %v1293_v61, %v1290_v25 }
 0x3a8   :  { %1906 = vmatprep.subr.bf16.mxu0 %v1361_v15  ;;  %v3147_v15 = vunpack.c.l.s8.bf16 %v2608_v14 }
 0x3a9   :  { %1907 = vmatpush3.bf16.msra.mxu0 %v1353_v3 }
 0x3aa   :  { %1908 = vmatprep.subr.bf16.mxu0 %v1362_v58 }
 0x3ad   :  { %1909 = vmatpush3.bf16.msra.mxu0 %v1354_v40 }
 0x3b2   :  { %v2104_v42 = vpop.f32.mrb[20].mxu0 }
 0x3b3   :  { %v1306_v33 = vpop.f32.mrb[21].mxu0 }
 0x3b4   :  { %v2105_v21 = vpop.f32.mrb[22].mxu0 }
 0x3b5   :  { %v1364_v31 = vpack.c.bf16 %v2105_v21, %v2104_v42  ;;  %v1309_v24 = vpop.f32.mrb[23].mxu0  ;;  %v3148_v42 = vunpack.c.h.s8.bf16 %v2597_v22  ;;  %v3154_v21 = vunpack.c.l.s8.bf16 %v2641_v52 }
 0x3b6   :  { %v1363_v28 = vpack.c.bf16 %v1309_v24, %v1306_v33  ;;  %v3153_v33 = vunpack.c.h.s8.bf16 %v2630_v43  ;;  %v3158_v24 = vunpack.c.l.s8.bf16 %v2663_v7 }
 0x3b8   :  { %1910 = vmatprep.subr.bf16.mxu0 %v1363_v28  ;;  %v3161_v28 = vunpack.c.h.s8.bf16 %v2674_v10 }
 0x3b9   :  { %1911 = vmatpush3.bf16.msra.mxu0 %v1355_v47  ;;  %v3144_v47 = vunpack.c.h.s8.bf16 %v2572_v39  ;;  %v3151_v39 = vunpack.c.l.s8.bf16 %v2630_v43  ;;  %v3160_v43 = vunpack.c.h.s8.bf16 %v2663_v7  ;;  %v3168_v7 = vld [vmem:[#allocation6_spill] sm:$0xff] }
 0x3ba   :  { %1912 = vmatprep.subr.bf16.mxu0 %v1364_v31  ;;  %v3157_v31 = vunpack.c.h.s8.bf16 %v2652_v63 }
 0x3bd   :  { %1913 = vmatpush3.bf16.msra.mxu0 %v1356_v57  ;;  %v3143_v57 = vunpack.c.l.s8.bf16 %v2586_v8 }
 0x3c2   :  { %v2108_v5 = vpop.f32.mrb[24].mxu0 }
 0x3c3   :  { %v1322_v55 = vpop.f32.mrb[25].mxu0 }
 0x3c4   :  { %v2109_v50 = vpop.f32.mrb[26].mxu0 }
 0x3c5   :  { %v1366_v49 = vpack.c.bf16 %v2109_v50, %v2108_v5  ;;  %v1325_v2 = vpop.f32.mrb[27].mxu0  ;;  %v3162_v5 = vunpack.c.l.s8.bf16 %v2685_v44  ;;  %v3166_v50 = vld [vmem:[#allocation5_spill] sm:$0xff] }
 0x3c6   :  { %v1365_v61 = vpack.c.bf16 %v1325_v2, %v1322_v55  ;;  %v3165_v55 = vunpack.c.h.s8.bf16 %v2696_v13  ;;  %v3169_v2 = vunpack.c.l.s8.bf16 %v3168_v7 }
 0x3c8   :  { %1914 = vmatprep.subr.bf16.mxu0 %v1365_v61  ;;  %v3171_v61 = vunpack.c.h.s8.bf16 %v3168_v7 }
 0x3c9   :  { %1915 = vmatpush3.bf16.msra.mxu0 %v1357_v23  ;;  %v3145_v23 = vunpack.c.h.s8.bf16 %v2586_v8  ;;  %v3152_v8 = vunpack.c.h.s8.bf16 %v2619_v34 }
 0x3ca   :  { %1916 = vmatprep.subr.bf16.mxu0 %v1366_v49  ;;  %v3167_v49 = vunpack.c.l.s8.bf16 %v3166_v50 }
 0x3cd   :  { %1917 = vmatpush3.bf16.msra.mxu0 %v1358_v35  ;;  %v3146_v35 = vunpack.c.l.s8.bf16 %v2597_v22  ;;  %v3155_v22 = vunpack.c.l.s8.bf16 %v2652_v63  ;;  %v3164_v63 = vunpack.c.h.s8.bf16 %v2685_v44  ;;  %v3174_v44 = vld [vmem:[#allocation8_spill] sm:$0xff] }
 0x3d2   :  { %v2112_v58 = vpop.f32.mrb[28].mxu0 }
 0x3d3   :  { %v1338_v40 = vpop.f32.mrb[29].mxu0 }
 0x3d4   :  { %v2113_v3 = vpop.f32.mrb[30].mxu0 }
 0x3d5   :  { %v1368_v1 = vpack.c.bf16 %v2113_v3, %v2112_v58  ;;  %v1341_v25 = vpop.f32.mrb[31].mxu0  ;;  %v3172_v58 = vld [vmem:[#allocation7_spill] sm:$0xff]  ;;  %v3175_v3 = vunpack.c.l.s8.bf16 %v3174_v44 }
 0x3d6   :  { %v1367_v4 = vpack.c.bf16 %v1341_v25, %v1338_v40  ;;  %v3173_v40 = vunpack.c.l.s8.bf16 %v3172_v58 }
 0x3d8   :  { %1918 = vmatprep.subr.bf16.mxu0 %v1367_v4 }
 0x3d9   :  { %1919 = vmatpush3.bf16.msra.mxu0 %v1359_v20  ;;  %v3150_v20 = vunpack.c.l.s8.bf16 %v2619_v34  ;;  %v3159_v34 = vunpack.c.l.s8.bf16 %v2674_v10  ;;  %v3170_v10 = vunpack.c.h.s8.bf16 %v3166_v50 }
 0x3da   :  { %1920 = vmatprep.subr.bf16.mxu0 %v1368_v1  ;;  %v3177_v1 = vunpack.c.h.s8.bf16 %v3174_v44 }
 0x3dd   :  { %1921 = vmatpush3.bf16.msra.mxu0 %v1360_v17  ;;  %v3149_v17 = vunpack.c.h.s8.bf16 %v2608_v14  ;;  %v3156_v14 = vunpack.c.h.s8.bf16 %v2641_v52  ;;  %v3163_v52 = vunpack.c.l.s8.bf16 %v2696_v13  ;;  %v3176_v13 = vunpack.c.h.s8.bf16 %v3172_v58 }
 0x3e0   :  { %1402 = vmatmul.mubr.bf16.vlgmr.msra.gmra.mrb[32].mxu0 %v3143_v57 }
 0x3e1   :  { %1409 = vmatprep.mubr.bf16.mxu0 %v3144_v47 }
 0x3e8   :  { %1410 = vmatmul.mubr.bf16.gmra.mrb[36].mxu0 %v3145_v23  ;;  %v3001_v23 = vld [vmem:[%s3084_s5] ss:$0 sm:$0xff]  ;;  %s2161_s5 = smov [#allocation2]  }
 0x3e9   :  { %1417 = vmatprep.mubr.bf16.mxu0 %v3146_v35  ;;  %s1638_s14 = sshll.u32 %s2161_s5, 4  ;;  %s1639_s14 = int_to_ptr.vmem [resolvable:$true] %s1638_s14 }
 0x3ea   :  { %s2136_s7 = scalar_lea.vmem %s1639_s14, 4096  ;;  %p2141_p1 = scmp.lt.s32.totalorder %s1639_s14, %s1639_s14 }
 0x3eb   :  { %p2137_p0 = scmp.ne.s32.totalorder %s1639_s14, %s2136_s7  ;;  %p2142_p2 = scmp.lt.s32.totalorder %s2136_s7, %s2136_s7 }
 0x3ed   :  { %p2143_p3 = por %p2142_p2, %p2141_p1 }
 0x3ef   :  { %p2144_p4 = pnand %p2143_p3, %p2137_p0 }
 0x3f0   :  { %1418 = vmatmul.mubr.bf16.gmra.mrb[40].mxu0 %v3147_v15  ;;  %v3178_v15 = vld [vmem:[#allocation9_spill] sm:$0xff] }
 0x3f1   :  { %1425 = vmatprep.mubr.bf16.mxu0 %v3148_v42 }
 0x3f8   :  { %1426 = vmatmul.mubr.bf16.gmra.mrb[44].mxu0 %v3149_v17 }
 0x3f9   :  { %1433 = vmatprep.mubr.bf16.mxu0 %v3150_v20 }
 0x400   :  { %1434 = vmatmul.mubr.bf16.gmra.mrb[48].mxu0 %v3151_v39  ;;  %v3179_v39 = vld [vmem:[#allocation10_spill] sm:$0xff] }
 0x401   :  { %1441 = vmatprep.mubr.bf16.mxu0 %v3152_v8 }
 0x408   :  { %1442 = vmatmul.mubr.bf16.gmra.mrb[52].mxu0 %v3153_v33 }
 0x409   :  { %1449 = vmatprep.mubr.bf16.mxu0 %v3154_v21 }
 0x410   :  { %1450 = vmatmul.mubr.bf16.gmra.mrb[56].mxu0 %v3155_v22 }
 0x411   :  { %1457 = vmatprep.mubr.bf16.mxu0 %v3156_v14 }
 0x418   :  { %1458 = vmatmul.mubr.bf16.gmra.mrb[60].mxu0 %v3157_v31 }
 0x419   :  { %1465 = vmatprep.mubr.bf16.mxu0 %v3158_v24 }
 0x420   :  { %1466 = vmatmul.mubr.bf16.gmra.mrb[64].mxu0 %v3159_v34 }
 0x421   :  { %1473 = vmatprep.mubr.bf16.mxu0 %v3160_v43 }
 0x428   :  { %1474 = vmatmul.mubr.bf16.gmra.mrb[68].mxu0 %v3161_v28 }
 0x429   :  { %1481 = vmatprep.mubr.bf16.mxu0 %v3162_v5 }
 0x430   :  { %1482 = vmatmul.mubr.bf16.gmra.mrb[72].mxu0 %v3163_v52 }
 0x431   :  { %1489 = vmatprep.mubr.bf16.mxu0 %v3164_v63 }
 0x438   :  { %1490 = vmatmul.mubr.bf16.gmra.mrb[76].mxu0 %v3165_v55 }
 0x439   :  { %1497 = vmatprep.mubr.bf16.mxu0 %v3167_v49 }
 0x440   :  { %1498 = vmatmul.mubr.bf16.gmra.mrb[80].mxu0 %v3169_v2 }
 0x441   :  { %1505 = vmatprep.mubr.bf16.mxu0 %v3170_v10 }
 0x448   :  { %1506 = vmatmul.mubr.bf16.gmra.mrb[84].mxu0 %v3171_v61 }
 0x449   :  { %1513 = vmatprep.mubr.bf16.mxu0 %v3173_v40 }
 0x450   :  { %1514 = vmatmul.mubr.bf16.gmra.mrb[88].mxu0 %v3175_v3 }
 0x451   :  { %1521 = vmatprep.mubr.bf16.mxu0 %v3176_v13 }
 0x458   :  { %1522 = vmatmul.mubr.bf16.gmra.mrb[92].mxu0 %v3177_v1 }
 0x4b3   :  { %v1922_v25 = vpop.f32.mrb[32].mxu0 }
 0x4b4   :  { %v1923_v4 = vpop.f32.mrb[33].mxu0 }
 0x4b5   :  { %v1924_v57 = vadd.f32 %v1923_v4, %v1922_v25  ;;  %v1925_v47 = vpop.f32.mrb[34].mxu0 }
 0x4b6   :  { %v1926_v35 = vpop.f32.mrb[35].mxu0 }
 0x4b7   :  { %v1530_v42 = vmul.f32 %v1924_v57, %v3178_v15  ;;  %v1927_v17 = vadd.f32 %v1926_v35, %v1925_v47 }
 0x4b9   :  { %v1569_v20 = vadd.f32 %v3001_v23, %v1530_v42  ;;  %v1531_v8 = vmul.f32 %v1927_v17, %v3179_v39 }
 0x4bb   :  { %1601 = vst [vmem:[#allocation2] sm:$0xff] %v1569_v20  ;;  %v1570_v33 = vadd.f32 %v3001_v23, %v1531_v8  ;;  %v1928_v21 = vpop.f32.mrb[36].mxu0 }
 0x4bc   :  { %v1929_v22 = vpop.f32.mrb[37].mxu0 }
 0x4bd   :  { %1602 = vst [vmem:[#allocation2 + $0x8] sm:$0xff] %v1570_v33  ;;  %v1930_v14 = vadd.f32 %v1929_v22, %v1928_v21  ;;  %v1931_v31 = vpop.f32.mrb[38].mxu0 }
 0x4be   :  { %v1932_v24 = vpop.f32.mrb[39].mxu0 }
 0x4bf   :  { %v1532_v34 = vmul.f32 %v1930_v14, %v2782_v60  ;;  %v1933_v43 = vadd.f32 %v1932_v24, %v1931_v31 }
 0x4c1   :  { %v1571_v28 = vadd.f32 %v3001_v23, %v1532_v34  ;;  %v1533_v5 = vmul.f32 %v1933_v43, %v2787_v32 }
 0x4c3   :  { %1603 = vst [vmem:[#allocation2 + $0x10] sm:$0xff] %v1571_v28  ;;  %v1572_v52 = vadd.f32 %v3001_v23, %v1533_v5  ;;  %v1934_v63 = vpop.f32.mrb[40].mxu0 }
 0x4c4   :  { %v1935_v55 = vpop.f32.mrb[41].mxu0 }
 0x4c5   :  { %1604 = vst [vmem:[#allocation2 + $0x18] sm:$0xff] %v1572_v52  ;;  %v1936_v50 = vadd.f32 %v1935_v55, %v1934_v63  ;;  %v1937_v49 = vpop.f32.mrb[42].mxu0 }
 0x4c6   :  { %v1938_v7 = vpop.f32.mrb[43].mxu0 }
 0x4c7   :  { %v1534_v2 = vmul.f32 %v1936_v50, %v2792_v9  ;;  %v1939_v10 = vadd.f32 %v1938_v7, %v1937_v49 }
 0x4c9   :  { %v1573_v61 = vadd.f32 %v3001_v23, %v1534_v2  ;;  %v1535_v60 = vmul.f32 %v1939_v10, %v2797_v41 }
 0x4cb   :  { %1605 = vst [vmem:[#allocation2 + $0x20] sm:$0xff] %v1573_v61  ;;  %v1574_v58 = vadd.f32 %v3001_v23, %v1535_v60  ;;  %v1940_v32 = vpop.f32.mrb[44].mxu0 }
 0x4cc   :  { %v1941_v40 = vpop.f32.mrb[45].mxu0 }
 0x4cd   :  { %1606 = vst [vmem:[#allocation2 + $0x28] sm:$0xff] %v1574_v58  ;;  %v1942_v44 = vadd.f32 %v1941_v40, %v1940_v32  ;;  %v1943_v3 = vpop.f32.mrb[46].mxu0 }
 0x4ce   :  { %v1944_v13 = vpop.f32.mrb[47].mxu0 }
 0x4cf   :  { %v1536_v1 = vmul.f32 %v1942_v44, %v2802_v12  ;;  %v1945_v25 = vadd.f32 %v1944_v13, %v1943_v3 }
 0x4d1   :  { %v1575_v4 = vadd.f32 %v3001_v23, %v1536_v1  ;;  %v1537_v9 = vmul.f32 %v1945_v25, %v2807_v59 }
 0x4d3   :  { %1607 = vst [vmem:[#allocation2 + $0x30] sm:$0xff] %v1575_v4  ;;  %v1576_v57 = vadd.f32 %v3001_v23, %v1537_v9  ;;  %v1946_v41 = vpop.f32.mrb[48].mxu0 }
 0x4d4   :  { %v1947_v47 = vpop.f32.mrb[49].mxu0 }
 0x4d5   :  { %1608 = vst [vmem:[#allocation2 + $0x38] sm:$0xff] %v1576_v57  ;;  %v1948_v35 = vadd.f32 %v1947_v47, %v1946_v41  ;;  %v1949_v15 = vpop.f32.mrb[50].mxu0 }
 0x4d6   :  { %v1950_v42 = vpop.f32.mrb[51].mxu0 }
 0x4d7   :  { %v1538_v17 = vmul.f32 %v1948_v35, %v2812_v11  ;;  %v1951_v20 = vadd.f32 %v1950_v42, %v1949_v15 }
 0x4d9   :  { %v1577_v39 = vadd.f32 %v3001_v23, %v1538_v17  ;;  %v1539_v12 = vmul.f32 %v1951_v20, %v2817_v56 }
 0x4db   :  { %1609 = vst [vmem:[#allocation2 + $0x40] sm:$0xff] %v1577_v39  ;;  %v1578_v8 = vadd.f32 %v3001_v23, %v1539_v12  ;;  %v1952_v59 = vpop.f32.mrb[52].mxu0 }
 0x4dc   :  { %v1953_v33 = vpop.f32.mrb[53].mxu0 }
 0x4dd   :  { %1610 = vst [vmem:[#allocation2 + $0x48] sm:$0xff] %v1578_v8  ;;  %v1954_v21 = vadd.f32 %v1953_v33, %v1952_v59  ;;  %v1955_v22 = vpop.f32.mrb[54].mxu0 }
 0x4de   :  { %v1956_v14 = vpop.f32.mrb[55].mxu0 }
 0x4df   :  { %v1540_v31 = vmul.f32 %v1954_v21, %v2822_v30  ;;  %v1957_v24 = vadd.f32 %v1956_v14, %v1955_v22 }
 0x4e1   :  { %v1579_v34 = vadd.f32 %v3001_v23, %v1540_v31  ;;  %v1541_v11 = vmul.f32 %v1957_v24, %v2827_v27 }
 0x4e3   :  { %1611 = vst [vmem:[#allocation2 + $0x50] sm:$0xff] %v1579_v34  ;;  %v1580_v43 = vadd.f32 %v3001_v23, %v1541_v11  ;;  %v1958_v56 = vpop.f32.mrb[56].mxu0 }
 0x4e4   :  { %v1959_v28 = vpop.f32.mrb[57].mxu0 }
 0x4e5   :  { %1612 = vst [vmem:[#allocation2 + $0x58] sm:$0xff] %v1580_v43  ;;  %v1960_v5 = vadd.f32 %v1959_v28, %v1958_v56  ;;  %v1961_v52 = vpop.f32.mrb[58].mxu0 }
 0x4e6   :  { %v1962_v63 = vpop.f32.mrb[59].mxu0 }
 0x4e7   :  { %v1542_v55 = vmul.f32 %v1960_v5, %v2832_v38  ;;  %v1963_v50 = vadd.f32 %v1962_v63, %v1961_v52 }
 0x4e9   :  { %v1581_v49 = vadd.f32 %v3001_v23, %v1542_v55  ;;  %v1543_v30 = vmul.f32 %v1963_v50, %v2837_v0 }
 0x4eb   :  { %1613 = vst [vmem:[#allocation2 + $0x60] sm:$0xff] %v1581_v49  ;;  %v1582_v7 = vadd.f32 %v3001_v23, %v1543_v30  ;;  %v1964_v27 = vpop.f32.mrb[60].mxu0 }
 0x4ec   :  { %v1965_v2 = vpop.f32.mrb[61].mxu0 }
 0x4ed   :  { %1614 = vst [vmem:[#allocation2 + $0x68] sm:$0xff] %v1582_v7  ;;  %v1966_v10 = vadd.f32 %v1965_v2, %v1964_v27  ;;  %v1967_v61 = vpop.f32.mrb[62].mxu0 }
 0x4ee   :  { %v1968_v60 = vpop.f32.mrb[63].mxu0 }
 0x4ef   :  { %v1544_v58 = vmul.f32 %v1966_v10, %v2842_v46  ;;  %v1969_v32 = vadd.f32 %v1968_v60, %v1967_v61 }
 0x4f1   :  { %v1583_v40 = vadd.f32 %v3001_v23, %v1544_v58  ;;  %v1545_v38 = vmul.f32 %v1969_v32, %v2847_v51 }
 0x4f3   :  { %1615 = vst [vmem:[#allocation2 + $0x70] sm:$0xff] %v1583_v40  ;;  %v1584_v44 = vadd.f32 %v3001_v23, %v1545_v38  ;;  %v1970_v0 = vpop.f32.mrb[64].mxu0 }
 0x4f4   :  { %v1971_v3 = vpop.f32.mrb[65].mxu0 }
 0x4f5   :  { %1616 = vst [vmem:[#allocation2 + $0x78] sm:$0xff] %v1584_v44  ;;  %v1972_v13 = vadd.f32 %v1971_v3, %v1970_v0  ;;  %v1973_v1 = vpop.f32.mrb[66].mxu0 }
 0x4f6   :  { %v1974_v25 = vpop.f32.mrb[67].mxu0 }
 0x4f7   :  { %v1546_v4 = vmul.f32 %v1972_v13, %v2852_v54  ;;  %v1975_v9 = vadd.f32 %v1974_v25, %v1973_v1 }
 0x4f9   :  { %v1585_v57 = vadd.f32 %v3001_v23, %v1546_v4  ;;  %v1547_v46 = vmul.f32 %v1975_v9, %v2857_v19 }
 0x4fb   :  { %1617 = vst [vmem:[#allocation2 + $0x80] sm:$0xff] %v1585_v57  ;;  %v1586_v41 = vadd.f32 %v3001_v23, %v1547_v46  ;;  %v1976_v51 = vpop.f32.mrb[68].mxu0 }
 0x4fc   :  { %v1977_v47 = vpop.f32.mrb[69].mxu0 }
 0x4fd   :  { %1618 = vst [vmem:[#allocation2 + $0x88] sm:$0xff] %v1586_v41  ;;  %v1978_v35 = vadd.f32 %v1977_v47, %v1976_v51  ;;  %v1979_v15 = vpop.f32.mrb[70].mxu0 }
 0x4fe   :  { %v1980_v42 = vpop.f32.mrb[71].mxu0 }
 0x4ff   :  { %v1548_v17 = vmul.f32 %v1978_v35, %v2862_v62  ;;  %v1981_v20 = vadd.f32 %v1980_v42, %v1979_v15  ;;  %v3181_v42 = vld [vmem:[#allocation12_spill] sm:$0xff] }
 0x501   :  { %v1587_v39 = vadd.f32 %v3001_v23, %v1548_v17  ;;  %v1549_v54 = vmul.f32 %v1981_v20, %v2867_v18 }
 0x503   :  { %1619 = vst [vmem:[#allocation2 + $0x90] sm:$0xff] %v1587_v39  ;;  %v1588_v12 = vadd.f32 %v3001_v23, %v1549_v54  ;;  %v1982_v19 = vpop.f32.mrb[72].mxu0  ;;  %v3182_v39 = vld [vmem:[#allocation13_spill] sm:$0xff] }
 0x504   :  { %v1983_v8 = vpop.f32.mrb[73].mxu0 }
 0x505   :  { %1620 = vst [vmem:[#allocation2 + $0x98] sm:$0xff] %v1588_v12  ;;  %v1984_v59 = vadd.f32 %v1983_v8, %v1982_v19  ;;  %v1985_v33 = vpop.f32.mrb[74].mxu0 }
 0x506   :  { %v1986_v21 = vpop.f32.mrb[75].mxu0 }
 0x507   :  { %v1550_v22 = vmul.f32 %v1984_v59, %v2872_v6  ;;  %v1987_v14 = vadd.f32 %v1986_v21, %v1985_v33 }
 0x509   :  { %v1589_v31 = vadd.f32 %v3001_v23, %v1550_v22  ;;  %v1551_v62 = vmul.f32 %v1987_v14, %v2877_v29 }
 0x50b   :  { %1621 = vst [vmem:[#allocation2 + $0xa0] sm:$0xff] %v1589_v31  ;;  %v1590_v24 = vadd.f32 %v3001_v23, %v1551_v62  ;;  %v1988_v18 = vpop.f32.mrb[76].mxu0 }
 0x50c   :  { %v1989_v34 = vpop.f32.mrb[77].mxu0 }
 0x50d   :  { %1622 = vst [vmem:[#allocation2 + $0xa8] sm:$0xff] %v1590_v24  ;;  %v1990_v11 = vadd.f32 %v1989_v34, %v1988_v18  ;;  %v1991_v43 = vpop.f32.mrb[78].mxu0 }
 0x50e   :  { %v1992_v56 = vpop.f32.mrb[79].mxu0 }
 0x50f   :  { %v1552_v28 = vmul.f32 %v1990_v11, %v2882_v16  ;;  %v1993_v5 = vadd.f32 %v1992_v56, %v1991_v43 }
 0x511   :  { %v1591_v52 = vadd.f32 %v3001_v23, %v1552_v28  ;;  %v1553_v6 = vmul.f32 %v1993_v5, %v2887_v37 }
 0x513   :  { %1623 = vst [vmem:[#allocation2 + $0xb0] sm:$0xff] %v1591_v52  ;;  %v1592_v63 = vadd.f32 %v3001_v23, %v1553_v6  ;;  %v1994_v29 = vpop.f32.mrb[80].mxu0 }
 0x514   :  { %v1995_v55 = vpop.f32.mrb[81].mxu0 }
 0x515   :  { %1624 = vst [vmem:[#allocation2 + $0xb8] sm:$0xff] %v1592_v63  ;;  %v1996_v50 = vadd.f32 %v1995_v55, %v1994_v29  ;;  %v1997_v49 = vpop.f32.mrb[82].mxu0 }
 0x516   :  { %v1998_v30 = vpop.f32.mrb[83].mxu0 }
 0x517   :  { %v1554_v7 = vmul.f32 %v1996_v50, %v2892_v26  ;;  %v1999_v27 = vadd.f32 %v1998_v30, %v1997_v49 }
 0x519   :  { %v1593_v2 = vadd.f32 %v3001_v23, %v1554_v7  ;;  %v1555_v16 = vmul.f32 %v1999_v27, %v2897_v45 }
 0x51b   :  { %1625 = vst [vmem:[#allocation2 + $0xc0] sm:$0xff] %v1593_v2  ;;  %v1594_v10 = vadd.f32 %v3001_v23, %v1555_v16  ;;  %v2000_v37 = vpop.f32.mrb[84].mxu0 }
 0x51c   :  { %v2001_v61 = vpop.f32.mrb[85].mxu0 }
 0x51d   :  { %1626 = vst [vmem:[#allocation2 + $0xc8] sm:$0xff] %v1594_v10  ;;  %v2002_v60 = vadd.f32 %v2001_v61, %v2000_v37  ;;  %v2003_v58 = vpop.f32.mrb[86].mxu0 }
 0x51e   :  { %v2004_v32 = vpop.f32.mrb[87].mxu0 }
 0x51f   :  { %v1556_v40 = vmul.f32 %v2002_v60, %v2902_v36  ;;  %v2005_v38 = vadd.f32 %v2004_v32, %v2003_v58  ;;  %v3180_v36 = vld [vmem:[#allocation11_spill] sm:$0xff] }
 0x521   :  { %v1595_v44 = vadd.f32 %v3001_v23, %v1556_v40  ;;  %v1557_v26 = vmul.f32 %v2005_v38, %v2907_v53 }
 0x523   :  { %1627 = vst [vmem:[#allocation2 + $0xd0] sm:$0xff] %v1595_v44  ;;  %v1596_v0 = vadd.f32 %v3001_v23, %v1557_v26  ;;  %v2006_v45 = vpop.f32.mrb[88].mxu0 }
 0x524   :  { %v2007_v3 = vpop.f32.mrb[89].mxu0 }
 0x525   :  { %1628 = vst [vmem:[#allocation2 + $0xd8] sm:$0xff] %v1596_v0  ;;  %v2008_v13 = vadd.f32 %v2007_v3, %v2006_v45  ;;  %v2009_v1 = vpop.f32.mrb[90].mxu0 }
 0x526   :  { %v2010_v25 = vpop.f32.mrb[91].mxu0 }
 0x527   :  { %v1558_v4 = vmul.f32 %v2008_v13, %v2912_v48  ;;  %v2011_v9 = vadd.f32 %v2010_v25, %v2009_v1 }
 0x529   :  { %v1597_v57 = vadd.f32 %v3001_v23, %v1558_v4  ;;  %v1559_v46 = vmul.f32 %v2011_v9, %v3180_v36 }
 0x52b   :  { %1629 = vst [vmem:[#allocation2 + $0xe0] sm:$0xff] %v1597_v57  ;;  %v1598_v41 = vadd.f32 %v3001_v23, %v1559_v46  ;;  %v2012_v53 = vpop.f32.mrb[92].mxu0 }
 0x52c   :  { %v2013_v51 = vpop.f32.mrb[93].mxu0 }
 0x52d   :  { %1630 = vst [vmem:[#allocation2 + $0xe8] sm:$0xff] %v1598_v41  ;;  %v2014_v47 = vadd.f32 %v2013_v51, %v2012_v53  ;;  %v2015_v35 = vpop.f32.mrb[94].mxu0 }
 0x52e   :  { %v2016_v15 = vpop.f32.mrb[95].mxu0 }
 0x52f   :  { %v1560_v17 = vmul.f32 %v2014_v47, %v3181_v42  ;;  %v2017_v20 = vadd.f32 %v2016_v15, %v2015_v35 }
 0x531   :  { %v1599_v48 = vadd.f32 %v3001_v23, %v1560_v17  ;;  %v1561_v54 = vmul.f32 %v2017_v20, %v3182_v39 }
 0x533   :  { %1631 = vst [vmem:[#allocation2 + $0xf0] sm:$0xff] %v1599_v48  ;;  %v1600_v12 = vadd.f32 %v3001_v23, %v1561_v54 }
 0x535   :  { %1632 = vst [vmem:[#allocation2 + $0xf8] sm:$0xff] %v1600_v12 }
 0x536   :  { %2147 = shalt.err (!%p2144_p4)
}
 0x537   :  { %s2148_s16 = scalar_lea.hbm %s3087_s8, 4096 }
 0x538   :  { %p2149_p5 = scmp.ne.s32.totalorder %s3087_s8, %s2148_s16  ;;  %p2152_p6 = scmp.lt.u32.totalorder %s2148_s16, %s3087_s8 }
 0x53a   :  { %p2154_p7 = pnand %p2152_p6, %p2149_p5 }
 0x53c   :  { %2157 = shalt.err (!%p2154_p7)
}
 0x53d   :  { %s2162_s21 = smov 128   ;;  %s2163_s22 = smov 8  }
 0x53e   :  { %1644 = dma.vmem_to_hbm [thread:$0]  %s1639_s14, 4096, %s3087_s8, [#allocation3], %s2162_s21, %s2162_s21, %s2163_s22  }
 0x53f   :  { %2158 = dma.done.wait [#allocation3], 4096  }
 0x540   :  { %2159 = vsyncadd [#allocation3], 4294963200 }
 0x541   :  { %1648 = vsyncpa [#allocation3], 1 }

</bundles_post_ra>
